<compile_context>
chip_gen: v7x
topology: tpu7x:2x2x1
jax: 0.10.0
libtpu: 0.0.40
codegen_flags: <defaults>
</compile_context>

<pallas_src>
import jax
import jax.numpy as jnp
from jax.experimental import pallas as pl
from jax.experimental.pallas import tpu as pltpu

_HP = 128   # per-gate hidden padding: each GRU gate gets one full lane tile
_CP = 128   # FC output lane padding (lane-dense output store)


def _gru_fc_kernel(x_ref, wih_ref, bih_ref, whh_ref, bhh_ref, wfc_ref, bfc_ref,
                   out_ref, gx_ref):
    """Whole GRU recurrence + FC head for one batch block.

    x_ref  : (T, Bb, Ip)      bf16 time-major input block (zero padded)
    wih_ref: (Ip, 3*Hp)       bf16 W_ih^T, gate blocks padded to Hp lanes each
    bih_ref: (1, 3*Hp)        f32  b_ih (gate-padded)
    whh_ref: (Hp, 3*Hp)       bf16 W_hh^T (gate-padded)
    bhh_ref: (1, 3*Hp)        f32  b_hh (gate-padded)
    wfc_ref: (Hp, Cp)         bf16 fc weight^T (padded)
    bfc_ref: (1, Cp)          f32  fc bias (padded)
    out_ref: (Bb, Cp)         f32  logits for this batch block
    gx_ref : (T*Bb, 3*Hp)     f32  VMEM scratch: precomputed input projections
    """
    T, Bb, Ip = x_ref.shape
    Hp = whh_ref.shape[0]

    # (1) Input projection for ALL timesteps in a single bf16 MXU matmul,
    #     accumulated in f32 and cached in VMEM scratch.
    x_all = x_ref[...].reshape(T * Bb, Ip)                           # (T*Bb, Ip)
    gx_ref[...] = (jnp.dot(x_all, wih_ref[...],
                           preferred_element_type=jnp.float32)
                   + bih_ref[...])                                   # (T*Bb, 3Hp)

    # Small loop-invariant broadcast (3 vregs at Bb=8) hoisted once.
    bhh = jnp.broadcast_to(bhh_ref[...], (Bb, 3 * Hp))

    def step(t, h):
        # Recurrent projection.  whh_ref[...] is fed directly to the dot
        # (NOT hoisted above the loop) so the bf16 RHS is re-loaded from VMEM
        # just before each MXU push instead of pinning 24+ vregs across all
        # unrolled steps.
        gh = jnp.dot(h.astype(whh_ref.dtype), whh_ref[...],
                     preferred_element_type=jnp.float32) + bhh       # (Bb, 3Hp)

        off = pl.multiple_of(t * Bb, Bb)
        gxt = gx_ref[pl.ds(off, Bb), :]                              # (Bb, 3Hp)

        # PyTorch GRU gate order (r, z, n); each gate is one 128-lane tile, so
        # these are static, lane-tile-aligned slices (no XLU lane shuffles).
        r = jax.nn.sigmoid(gxt[:, 0 * Hp:1 * Hp] + gh[:, 0 * Hp:1 * Hp])
        z = jax.nn.sigmoid(gxt[:, 1 * Hp:2 * Hp] + gh[:, 1 * Hp:2 * Hp])
        n = jnp.tanh(gxt[:, 2 * Hp:3 * Hp] + r * gh[:, 2 * Hp:3 * Hp])
        return (1.0 - z) * n + z * h

    h0 = jnp.zeros((Bb, Hp), jnp.float32)
    # Bounded unroll: full unroll at small T, capped at 8 so code size and vreg
    # live ranges stay bounded at realistic HAR sequence lengths (T ~ 128).
    hT = jax.lax.fori_loop(0, T, step, h0, unroll=min(T, 8))

    # FC head on the final hidden state (lane-dense 128-wide output store).
    out_ref[...] = (jnp.dot(hT.astype(wfc_ref.dtype), wfc_ref[...],
                            preferred_element_type=jnp.float32)
                    + bfc_ref[...])


def prepare_har_gru_params(w_ih, w_hh, b_ih, b_hh, w_fc, b_fc):
    """One-time weight prep (transpose / gate-pad / bf16 cast).

    Hoisted out of the per-call path so it is not re-executed on every forward.
    w_ih: (3H, I)  w_hh: (3H, H)  b_ih/b_hh: (3H,)  w_fc: (C, H)  b_fc: (C,)
    Gate order in the stacked weights is PyTorch's (r, z, n).
    """
    I = w_ih.shape[1]
    H = w_hh.shape[1]
    C = w_fc.shape[0]
    Hp, Cp = _HP, _CP
    Ip = 8 * pl.cdiv(I, 8)      # tiny sublane pad only; no 128-lane pad in HBM

    def pad_gate_cols(w_t, K, Kp):
        # w_t: (K, 3H) with gate blocks of width H -> (Kp, 3*Hp), zero padded
        g = w_t.reshape(K, 3, H)
        g = jnp.pad(g, ((0, Kp - K), (0, 0), (0, Hp - H)))
        return g.reshape(Kp, 3 * Hp)

    def pad_gate_bias(b):
        g = b.astype(jnp.float32).reshape(3, H)
        g = jnp.pad(g, ((0, 0), (0, Hp - H)))
        return g.reshape(1, 3 * Hp)

    wih_p = pad_gate_cols(jnp.transpose(w_ih).astype(jnp.float32), I, Ip
                          ).astype(jnp.bfloat16)                     # (Ip, 3Hp)
    whh_p = pad_gate_cols(jnp.transpose(w_hh).astype(jnp.float32), H, Hp
                          ).astype(jnp.bfloat16)                     # (Hp, 3Hp)
    bih_p = pad_gate_bias(b_ih)                                      # (1, 3Hp)
    bhh_p = pad_gate_bias(b_hh)                                      # (1, 3Hp)
    wfc_p = jnp.pad(jnp.transpose(w_fc).astype(jnp.float32),
                    ((0, Hp - H), (0, Cp - C))).astype(jnp.bfloat16) # (Hp, Cp)
    bfc_p = jnp.pad(b_fc.astype(jnp.float32), (0, Cp - C)).reshape(1, Cp)

    meta = {"I": I, "Ip": Ip, "H": H, "C": C}
    return (wih_p, bih_p, whh_p, bhh_p, wfc_p, bfc_p), meta


def har_gru_forward(x, prepared, meta, *, max_block_b=128):
    """x: (B, T, I) f32; prepared/meta from prepare_har_gru_params.  -> (B, C) f32."""
    wih_p, bih_p, whh_p, bhh_p, wfc_p, bfc_p = prepared
    B, T, I = x.shape
    Ip, C = meta["Ip"], meta["C"]
    Hp, Cp = _HP, _CP
    assert I == meta["I"]

    # Batch block: a multiple of 8 (sublane) so the in-kernel
    # (T,Bb,Ip)->(T*Bb,Ip) reshape stays copy-free; grows with batch to
    # amortize per-step MXU latency, capped to keep VMEM in check on v7x.
    block_b = min(max_block_b, 8 * pl.cdiv(B, 8))
    n_bblk = pl.cdiv(B, block_b)
    Bp = block_b * n_bblk

    # Time-major so the serial loop slices the leading axis; bf16 for the MXU.
    x_p = jnp.pad(jnp.transpose(x.astype(jnp.float32), (1, 0, 2)),
                  ((0, 0), (0, Bp - B), (0, Ip - I))).astype(jnp.bfloat16)

    out = pl.pallas_call(
        _gru_fc_kernel,
        out_shape=jax.ShapeDtypeStruct((Bp, Cp), jnp.float32),
        grid_spec=pltpu.PrefetchScalarGridSpec(
            num_scalar_prefetch=0,
            grid=(n_bblk,),                   # batch blocks only; time is in-kernel
            in_specs=[
                pl.BlockSpec((T, block_b, Ip), lambda b: (0, b, 0)),   # x block
                pl.BlockSpec((Ip, 3 * Hp), lambda b: (0, 0)),          # W_ih^T
                pl.BlockSpec((1, 3 * Hp), lambda b: (0, 0)),           # b_ih
                pl.BlockSpec((Hp, 3 * Hp), lambda b: (0, 0)),          # W_hh^T
                pl.BlockSpec((1, 3 * Hp), lambda b: (0, 0)),           # b_hh
                pl.BlockSpec((Hp, Cp), lambda b: (0, 0)),              # W_fc^T
                pl.BlockSpec((1, Cp), lambda b: (0, 0)),               # b_fc
            ],
            out_specs=pl.BlockSpec((block_b, Cp), lambda b: (b, 0)),
            scratch_shapes=[
                pltpu.VMEM((T * block_b, 3 * Hp), jnp.float32),  # x-projections
            ],
        ),
        compiler_params=pltpu.CompilerParams(
            dimension_semantics=("parallel",),   # batch blocks independent
            vmem_limit_bytes=32 * 1024 * 1024),  # safe on v5e/v6e/v7x
    )(x_p, wih_p, bih_p, whh_p, bhh_p, wfc_p, bfc_p)

    return out[:B, :C]


def _reference_forward(x, w_ih, w_hh, b_ih, b_hh, w_fc, b_fc):
    """Pure-JAX f32 reference matching PyTorch nn.GRU (gate order r, z, n) + Linear."""
    B, T, I = x.shape
    H = w_hh.shape[1]

    def step(h, x_t):
        gx = x_t @ w_ih.T + b_ih
        gh = h @ w_hh.T + b_hh
        r = jax.nn.sigmoid(gx[:, 0:H] + gh[:, 0:H])
        z = jax.nn.sigmoid(gx[:, H:2 * H] + gh[:, H:2 * H])
        n = jnp.tanh(gx[:, 2 * H:3 * H] + r * gh[:, 2 * H:3 * H])
        h = (1.0 - z) * n + z * h
        return h, None

    h0 = jnp.zeros((B, H), jnp.float32)
    hT, _ = jax.lax.scan(step, h0, jnp.swapaxes(x, 0, 1))
    return hT @ w_fc.T + b_fc


if __name__ == "__main__":
    # HarGRU defaults: input_size=6, hidden_size=30, num_classes=12, 1 layer.
    input_size, hidden_size, num_classes = 6, 30, 12
    batch, seq_len = 2, 8

    key = jax.random.PRNGKey(0)
    k = jax.random.split(key, 7)
    bound = 1.0 / (hidden_size ** 0.5)

    # Deterministic synthetic parameters with PyTorch GRU/Linear shapes.
    w_ih = jax.random.uniform(k[0], (3 * hidden_size, input_size),
                              jnp.float32, -bound, bound)
    w_hh = jax.random.uniform(k[1], (3 * hidden_size, hidden_size),
                              jnp.float32, -bound, bound)
    b_ih = jax.random.uniform(k[2], (3 * hidden_size,), jnp.float32, -bound, bound)
    b_hh = jax.random.uniform(k[3], (3 * hidden_size,), jnp.float32, -bound, bound)
    w_fc = jax.random.uniform(k[4], (num_classes, hidden_size),
                              jnp.float32, -bound, bound)
    b_fc = jax.random.uniform(k[5], (num_classes,), jnp.float32, -bound, bound)

    x = jax.random.normal(k[6], (batch, seq_len, input_size), jnp.float32)

    # One-time weight prep (hoisted out of the per-call path).
    prepared, meta = prepare_har_gru_params(w_ih, w_hh, b_ih, b_hh, w_fc, b_fc)

    logits = har_gru_forward(x, prepared, meta)
    logits = jax.block_until_ready(logits)

    ref = _reference_forward(x, w_ih, w_hh, b_ih, b_hh, w_fc, b_fc)
    assert logits.shape == (batch, num_classes)
    # bf16 MXU inputs -> looser tolerance vs the f32 reference.
    max_err = float(jnp.max(jnp.abs(logits - ref)))
    assert max_err < 3e-2, f"mismatch vs reference: max abs err {max_err}"

    print("KERNEL_OK")
</pallas_src>

<mosaic_0001>
module attributes {stable_mosaic.version = 11 : i64} {
  func.func @_gru_fc_kernel(%arg0: i32, %arg1: memref<8x8x8xbf16, #tpu.memory_space<vmem>>, %arg2: memref<8x384xbf16, #tpu.memory_space<vmem>>, %arg3: memref<1x384xf32, #tpu.memory_space<vmem>>, %arg4: memref<128x384xbf16, #tpu.memory_space<vmem>>, %arg5: memref<1x384xf32, #tpu.memory_space<vmem>>, %arg6: memref<128x128xbf16, #tpu.memory_space<vmem>>, %arg7: memref<1x128xf32, #tpu.memory_space<vmem>>, %arg8: memref<8x128xf32, #tpu.memory_space<vmem>>, %arg9: memref<64x384xf32, #tpu.memory_space<vmem>>) attributes {dimension_semantics = [#tpu.dimension_semantics<parallel>], iteration_bounds = array<i64: 1>, scalar_prefetch = 0 : i64, scratch_operands = 1 : i64, tpu.core_type = #tpu.core_type<tc>, window_params = [{transform_indices = @transform_0, window_bounds = array<i64: 8, 8, 8>}, {pipeline_mode = #tpu.pipeline_mode<synchronous>, transform_indices = @transform_1, window_bounds = array<i64: 8, 384>}, {pipeline_mode = #tpu.pipeline_mode<synchronous>, transform_indices = @transform_2, window_bounds = array<i64: 1, 384>}, {pipeline_mode = #tpu.pipeline_mode<synchronous>, transform_indices = @transform_3, window_bounds = array<i64: 128, 384>}, {pipeline_mode = #tpu.pipeline_mode<synchronous>, transform_indices = @transform_4, window_bounds = array<i64: 1, 384>}, {pipeline_mode = #tpu.pipeline_mode<synchronous>, transform_indices = @transform_5, window_bounds = array<i64: 128, 128>}, {pipeline_mode = #tpu.pipeline_mode<synchronous>, transform_indices = @transform_6, window_bounds = array<i64: 1, 128>}, {transform_indices = @transform_7, window_bounds = array<i64: 8, 128>}]} {
    %c0 = arith.constant 0 : index
    %c0_0 = arith.constant 0 : index
    %c0_1 = arith.constant 0 : index
    %0 = vector.load %arg1[%c0, %c0_0, %c0_1] : memref<8x8x8xbf16, #tpu.memory_space<vmem>>, vector<8x8x8xbf16>
    %1 = vector.shape_cast %0 : vector<8x8x8xbf16> to vector<64x8xbf16>
    %c0_2 = arith.constant 0 : index
    %c0_3 = arith.constant 0 : index
    %2 = vector.load %arg2[%c0_2, %c0_3] : memref<8x384xbf16, #tpu.memory_space<vmem>>, vector<8x384xbf16>
    %cst = arith.constant dense<0.000000e+00> : vector<64x384xf32>
    %3 = tpu.matmul %1, %2, %cst {dimension_numbers = #tpu.dot_dimension_numbers<[1], [0], [0], [1], [0, 0, 1, 1], [], []>} : vector<64x8xbf16>, vector<8x384xbf16>, vector<64x384xf32> -> vector<64x384xf32>
    %c0_4 = arith.constant 0 : index
    %c0_5 = arith.constant 0 : index
    %4 = vector.load %arg3[%c0_4, %c0_5] : memref<1x384xf32, #tpu.memory_space<vmem>>, vector<1x384xf32>
    %5 = vector.broadcast %4 : vector<1x384xf32> to vector<64x384xf32>
    %6 = arith.addf %3, %5 : vector<64x384xf32>
    %c0_6 = arith.constant 0 : index
    %c0_7 = arith.constant 0 : index
    %7 = vector.load %arg9[%c0_6, %c0_7] : memref<64x384xf32, #tpu.memory_space<vmem>>, vector<64x384xf32>
    tpu.vector_store %arg9[%c0_6, %c0_7], %6 {strides = array<i32>} : memref<64x384xf32, #tpu.memory_space<vmem>>, vector<64x384xf32>,
    %c0_8 = arith.constant 0 : index
    %c0_9 = arith.constant 0 : index
    %8 = vector.load %arg5[%c0_8, %c0_9] : memref<1x384xf32, #tpu.memory_space<vmem>>, vector<1x384xf32>
    %9 = vector.shape_cast %8 : vector<1x384xf32> to vector<1x384xf32>
    %10 = vector.broadcast %9 : vector<1x384xf32> to vector<8x384xf32>
    %cst_10 = arith.constant 0.000000e+00 : f32
    %11 = vector.broadcast %cst_10 : f32 to vector<8x128xf32>
    %c0_i32 = arith.constant 0 : i32
    %12 = arith.truncf %11 : vector<8x128xf32> to vector<8x128xbf16>
    %c0_11 = arith.constant 0 : index
    %c0_12 = arith.constant 0 : index
    %13 = vector.load %arg4[%c0_11, %c0_12] : memref<128x384xbf16, #tpu.memory_space<vmem>>, vector<128x384xbf16>
    %cst_13 = arith.constant dense<0.000000e+00> : vector<8x384xf32>
    %14 = tpu.matmul %12, %13, %cst_13 {dimension_numbers = #tpu.dot_dimension_numbers<[1], [0], [0], [1], [0, 0, 1, 1], [], []>} : vector<8x128xbf16>, vector<128x384xbf16>, vector<8x384xf32> -> vector<8x384xf32>
    %15 = arith.addf %14, %10 : vector<8x384xf32>
    %c8_i32 = arith.constant 8 : i32
    %16 = arith.muli %c0_i32, %c8_i32 : i32
    %17 = tpu.assume_multiple %16, 8 : i32
    %18 = arith.index_cast %17 : i32 to index
    %c0_14 = arith.constant 0 : index
    %19 = vector.load %arg9[%18, %c0_14] : memref<64x384xf32, #tpu.memory_space<vmem>>, vector<8x384xf32>
    %20 = vector.extract_strided_slice %19 {offsets = [0, 0], sizes = [8, 128], strides = [1, 1]} : vector<8x384xf32> to vector<8x128xf32>
    %21 = vector.extract_strided_slice %15 {offsets = [0, 0], sizes = [8, 128], strides = [1, 1]} : vector<8x384xf32> to vector<8x128xf32>
    %22 = arith.addf %20, %21 : vector<8x128xf32>
    %23 = arith.negf %22 : vector<8x128xf32>
    %24 = math.exp %23 : vector<8x128xf32>
    %cst_15 = arith.constant 1.000000e+00 : f32
    %25 = vector.broadcast %cst_15 : f32 to vector<8x128xf32>
    %26 = arith.addf %25, %24 : vector<8x128xf32>
    %27 = arith.divf %25, %26 : vector<8x128xf32>
    %28 = vector.extract_strided_slice %19 {offsets = [0, 128], sizes = [8, 128], strides = [1, 1]} : vector<8x384xf32> to vector<8x128xf32>
    %29 = vector.extract_strided_slice %15 {offsets = [0, 128], sizes = [8, 128], strides = [1, 1]} : vector<8x384xf32> to vector<8x128xf32>
    %30 = arith.addf %28, %29 : vector<8x128xf32>
    %31 = arith.negf %30 : vector<8x128xf32>
    %32 = math.exp %31 : vector<8x128xf32>
    %cst_16 = arith.constant 1.000000e+00 : f32
    %33 = vector.broadcast %cst_16 : f32 to vector<8x128xf32>
    %34 = arith.addf %33, %32 : vector<8x128xf32>
    %35 = arith.divf %33, %34 : vector<8x128xf32>
    %36 = vector.extract_strided_slice %19 {offsets = [0, 256], sizes = [8, 128], strides = [1, 1]} : vector<8x384xf32> to vector<8x128xf32>
    %37 = vector.extract_strided_slice %15 {offsets = [0, 256], sizes = [8, 128], strides = [1, 1]} : vector<8x384xf32> to vector<8x128xf32>
    %38 = arith.mulf %27, %37 : vector<8x128xf32>
    %39 = arith.addf %36, %38 : vector<8x128xf32>
    %40 = math.tanh %39 : vector<8x128xf32>
    %cst_17 = arith.constant 1.000000e+00 : f32
    %41 = vector.broadcast %cst_17 : f32 to vector<8x128xf32>
    %42 = arith.subf %41, %35 : vector<8x128xf32>
    %43 = arith.mulf %42, %40 : vector<8x128xf32>
    %44 = arith.mulf %35, %11 : vector<8x128xf32>
    %45 = arith.addf %43, %44 : vector<8x128xf32>
    %c1_i32 = arith.constant 1 : i32
    %46 = arith.truncf %45 : vector<8x128xf32> to vector<8x128xbf16>
    %c0_18 = arith.constant 0 : index
    %c0_19 = arith.constant 0 : index
    %47 = vector.load %arg4[%c0_18, %c0_19] : memref<128x384xbf16, #tpu.memory_space<vmem>>, vector<128x384xbf16>
    %cst_20 = arith.constant dense<0.000000e+00> : vector<8x384xf32>
    %48 = tpu.matmul %46, %47, %cst_20 {dimension_numbers = #tpu.dot_dimension_numbers<[1], [0], [0], [1], [0, 0, 1, 1], [], []>} : vector<8x128xbf16>, vector<128x384xbf16>, vector<8x384xf32> -> vector<8x384xf32>
    %49 = arith.addf %48, %10 : vector<8x384xf32>
    %c8_i32_21 = arith.constant 8 : i32
    %50 = arith.muli %c1_i32, %c8_i32_21 : i32
    %51 = tpu.assume_multiple %50, 8 : i32
    %52 = arith.index_cast %51 : i32 to index
    %c0_22 = arith.constant 0 : index
    %53 = vector.load %arg9[%52, %c0_22] : memref<64x384xf32, #tpu.memory_space<vmem>>, vector<8x384xf32>
    %54 = vector.extract_strided_slice %53 {offsets = [0, 0], sizes = [8, 128], strides = [1, 1]} : vector<8x384xf32> to vector<8x128xf32>
    %55 = vector.extract_strided_slice %49 {offsets = [0, 0], sizes = [8, 128], strides = [1, 1]} : vector<8x384xf32> to vector<8x128xf32>
    %56 = arith.addf %54, %55 : vector<8x128xf32>
    %57 = arith.negf %56 : vector<8x128xf32>
    %58 = math.exp %57 : vector<8x128xf32>
    %cst_23 = arith.constant 1.000000e+00 : f32
    %59 = vector.broadcast %cst_23 : f32 to vector<8x128xf32>
    %60 = arith.addf %59, %58 : vector<8x128xf32>
    %61 = arith.divf %59, %60 : vector<8x128xf32>
    %62 = vector.extract_strided_slice %53 {offsets = [0, 128], sizes = [8, 128], strides = [1, 1]} : vector<8x384xf32> to vector<8x128xf32>
    %63 = vector.extract_strided_slice %49 {offsets = [0, 128], sizes = [8, 128], strides = [1, 1]} : vector<8x384xf32> to vector<8x128xf32>
    %64 = arith.addf %62, %63 : vector<8x128xf32>
    %65 = arith.negf %64 : vector<8x128xf32>
    %66 = math.exp %65 : vector<8x128xf32>
    %cst_24 = arith.constant 1.000000e+00 : f32
    %67 = vector.broadcast %cst_24 : f32 to vector<8x128xf32>
    %68 = arith.addf %67, %66 : vector<8x128xf32>
    %69 = arith.divf %67, %68 : vector<8x128xf32>
    %70 = vector.extract_strided_slice %53 {offsets = [0, 256], sizes = [8, 128], strides = [1, 1]} : vector<8x384xf32> to vector<8x128xf32>
    %71 = vector.extract_strided_slice %49 {offsets = [0, 256], sizes = [8, 128], strides = [1, 1]} : vector<8x384xf32> to vector<8x128xf32>
    %72 = arith.mulf %61, %71 : vector<8x128xf32>
    %73 = arith.addf %70, %72 : vector<8x128xf32>
    %74 = math.tanh %73 : vector<8x128xf32>
    %cst_25 = arith.constant 1.000000e+00 : f32
    %75 = vector.broadcast %cst_25 : f32 to vector<8x128xf32>
    %76 = arith.subf %75, %69 : vector<8x128xf32>
    %77 = arith.mulf %76, %74 : vector<8x128xf32>
    %78 = arith.mulf %69, %45 : vector<8x128xf32>
    %79 = arith.addf %77, %78 : vector<8x128xf32>
    %c2_i32 = arith.constant 2 : i32
    %80 = arith.truncf %79 : vector<8x128xf32> to vector<8x128xbf16>
    %c0_26 = arith.constant 0 : index
    %c0_27 = arith.constant 0 : index
    %81 = vector.load %arg4[%c0_26, %c0_27] : memref<128x384xbf16, #tpu.memory_space<vmem>>, vector<128x384xbf16>
    %cst_28 = arith.constant dense<0.000000e+00> : vector<8x384xf32>
    %82 = tpu.matmul %80, %81, %cst_28 {dimension_numbers = #tpu.dot_dimension_numbers<[1], [0], [0], [1], [0, 0, 1, 1], [], []>} : vector<8x128xbf16>, vector<128x384xbf16>, vector<8x384xf32> -> vector<8x384xf32>
    %83 = arith.addf %82, %10 : vector<8x384xf32>
    %c8_i32_29 = arith.constant 8 : i32
    %84 = arith.muli %c2_i32, %c8_i32_29 : i32
    %85 = tpu.assume_multiple %84, 8 : i32
    %86 = arith.index_cast %85 : i32 to index
    %c0_30 = arith.constant 0 : index
    %87 = vector.load %arg9[%86, %c0_30] : memref<64x384xf32, #tpu.memory_space<vmem>>, vector<8x384xf32>
    %88 = vector.extract_strided_slice %87 {offsets = [0, 0], sizes = [8, 128], strides = [1, 1]} : vector<8x384xf32> to vector<8x128xf32>
    %89 = vector.extract_strided_slice %83 {offsets = [0, 0], sizes = [8, 128], strides = [1, 1]} : vector<8x384xf32> to vector<8x128xf32>
    %90 = arith.addf %88, %89 : vector<8x128xf32>
    %91 = arith.negf %90 : vector<8x128xf32>
    %92 = math.exp %91 : vector<8x128xf32>
    %cst_31 = arith.constant 1.000000e+00 : f32
    %93 = vector.broadcast %cst_31 : f32 to vector<8x128xf32>
    %94 = arith.addf %93, %92 : vector<8x128xf32>
    %95 = arith.divf %93, %94 : vector<8x128xf32>
    %96 = vector.extract_strided_slice %87 {offsets = [0, 128], sizes = [8, 128], strides = [1, 1]} : vector<8x384xf32> to vector<8x128xf32>
    %97 = vector.extract_strided_slice %83 {offsets = [0, 128], sizes = [8, 128], strides = [1, 1]} : vector<8x384xf32> to vector<8x128xf32>
    %98 = arith.addf %96, %97 : vector<8x128xf32>
    %99 = arith.negf %98 : vector<8x128xf32>
    %100 = math.exp %99 : vector<8x128xf32>
    %cst_32 = arith.constant 1.000000e+00 : f32
    %101 = vector.broadcast %cst_32 : f32 to vector<8x128xf32>
    %102 = arith.addf %101, %100 : vector<8x128xf32>
    %103 = arith.divf %101, %102 : vector<8x128xf32>
    %104 = vector.extract_strided_slice %87 {offsets = [0, 256], sizes = [8, 128], strides = [1, 1]} : vector<8x384xf32> to vector<8x128xf32>
    %105 = vector.extract_strided_slice %83 {offsets = [0, 256], sizes = [8, 128], strides = [1, 1]} : vector<8x384xf32> to vector<8x128xf32>
    %106 = arith.mulf %95, %105 : vector<8x128xf32>
    %107 = arith.addf %104, %106 : vector<8x128xf32>
    %108 = math.tanh %107 : vector<8x128xf32>
    %cst_33 = arith.constant 1.000000e+00 : f32
    %109 = vector.broadcast %cst_33 : f32 to vector<8x128xf32>
    %110 = arith.subf %109, %103 : vector<8x128xf32>
    %111 = arith.mulf %110, %108 : vector<8x128xf32>
    %112 = arith.mulf %103, %79 : vector<8x128xf32>
    %113 = arith.addf %111, %112 : vector<8x128xf32>
    %c3_i32 = arith.constant 3 : i32
    %114 = arith.truncf %113 : vector<8x128xf32> to vector<8x128xbf16>
    %c0_34 = arith.constant 0 : index
    %c0_35 = arith.constant 0 : index
    %115 = vector.load %arg4[%c0_34, %c0_35] : memref<128x384xbf16, #tpu.memory_space<vmem>>, vector<128x384xbf16>
    %cst_36 = arith.constant dense<0.000000e+00> : vector<8x384xf32>
    %116 = tpu.matmul %114, %115, %cst_36 {dimension_numbers = #tpu.dot_dimension_numbers<[1], [0], [0], [1], [0, 0, 1, 1], [], []>} : vector<8x128xbf16>, vector<128x384xbf16>, vector<8x384xf32> -> vector<8x384xf32>
    %117 = arith.addf %116, %10 : vector<8x384xf32>
    %c8_i32_37 = arith.constant 8 : i32
    %118 = arith.muli %c3_i32, %c8_i32_37 : i32
    %119 = tpu.assume_multiple %118, 8 : i32
    %120 = arith.index_cast %119 : i32 to index
    %c0_38 = arith.constant 0 : index
    %121 = vector.load %arg9[%120, %c0_38] : memref<64x384xf32, #tpu.memory_space<vmem>>, vector<8x384xf32>
    %122 = vector.extract_strided_slice %121 {offsets = [0, 0], sizes = [8, 128], strides = [1, 1]} : vector<8x384xf32> to vector<8x128xf32>
    %123 = vector.extract_strided_slice %117 {offsets = [0, 0], sizes = [8, 128], strides = [1, 1]} : vector<8x384xf32> to vector<8x128xf32>
    %124 = arith.addf %122, %123 : vector<8x128xf32>
    %125 = arith.negf %124 : vector<8x128xf32>
    %126 = math.exp %125 : vector<8x128xf32>
    %cst_39 = arith.constant 1.000000e+00 : f32
    %127 = vector.broadcast %cst_39 : f32 to vector<8x128xf32>
    %128 = arith.addf %127, %126 : vector<8x128xf32>
    %129 = arith.divf %127, %128 : vector<8x128xf32>
    %130 = vector.extract_strided_slice %121 {offsets = [0, 128], sizes = [8, 128], strides = [1, 1]} : vector<8x384xf32> to vector<8x128xf32>
    %131 = vector.extract_strided_slice %117 {offsets = [0, 128], sizes = [8, 128], strides = [1, 1]} : vector<8x384xf32> to vector<8x128xf32>
    %132 = arith.addf %130, %131 : vector<8x128xf32>
    %133 = arith.negf %132 : vector<8x128xf32>
    %134 = math.exp %133 : vector<8x128xf32>
    %cst_40 = arith.constant 1.000000e+00 : f32
    %135 = vector.broadcast %cst_40 : f32 to vector<8x128xf32>
    %136 = arith.addf %135, %134 : vector<8x128xf32>
    %137 = arith.divf %135, %136 : vector<8x128xf32>
    %138 = vector.extract_strided_slice %121 {offsets = [0, 256], sizes = [8, 128], strides = [1, 1]} : vector<8x384xf32> to vector<8x128xf32>
    %139 = vector.extract_strided_slice %117 {offsets = [0, 256], sizes = [8, 128], strides = [1, 1]} : vector<8x384xf32> to vector<8x128xf32>
    %140 = arith.mulf %129, %139 : vector<8x128xf32>
    %141 = arith.addf %138, %140 : vector<8x128xf32>
    %142 = math.tanh %141 : vector<8x128xf32>
    %cst_41 = arith.constant 1.000000e+00 : f32
    %143 = vector.broadcast %cst_41 : f32 to vector<8x128xf32>
    %144 = arith.subf %143, %137 : vector<8x128xf32>
    %145 = arith.mulf %144, %142 : vector<8x128xf32>
    %146 = arith.mulf %137, %113 : vector<8x128xf32>
    %147 = arith.addf %145, %146 : vector<8x128xf32>
    %c4_i32 = arith.constant 4 : i32
    %148 = arith.truncf %147 : vector<8x128xf32> to vector<8x128xbf16>
    %c0_42 = arith.constant 0 : index
    %c0_43 = arith.constant 0 : index
    %149 = vector.load %arg4[%c0_42, %c0_43] : memref<128x384xbf16, #tpu.memory_space<vmem>>, vector<128x384xbf16>
    %cst_44 = arith.constant dense<0.000000e+00> : vector<8x384xf32>
    %150 = tpu.matmul %148, %149, %cst_44 {dimension_numbers = #tpu.dot_dimension_numbers<[1], [0], [0], [1], [0, 0, 1, 1], [], []>} : vector<8x128xbf16>, vector<128x384xbf16>, vector<8x384xf32> -> vector<8x384xf32>
    %151 = arith.addf %150, %10 : vector<8x384xf32>
    %c8_i32_45 = arith.constant 8 : i32
    %152 = arith.muli %c4_i32, %c8_i32_45 : i32
    %153 = tpu.assume_multiple %152, 8 : i32
    %154 = arith.index_cast %153 : i32 to index
    %c0_46 = arith.constant 0 : index
    %155 = vector.load %arg9[%154, %c0_46] : memref<64x384xf32, #tpu.memory_space<vmem>>, vector<8x384xf32>
    %156 = vector.extract_strided_slice %155 {offsets = [0, 0], sizes = [8, 128], strides = [1, 1]} : vector<8x384xf32> to vector<8x128xf32>
    %157 = vector.extract_strided_slice %151 {offsets = [0, 0], sizes = [8, 128], strides = [1, 1]} : vector<8x384xf32> to vector<8x128xf32>
    %158 = arith.addf %156, %157 : vector<8x128xf32>
    %159 = arith.negf %158 : vector<8x128xf32>
    %160 = math.exp %159 : vector<8x128xf32>
    %cst_47 = arith.constant 1.000000e+00 : f32
    %161 = vector.broadcast %cst_47 : f32 to vector<8x128xf32>
    %162 = arith.addf %161, %160 : vector<8x128xf32>
    %163 = arith.divf %161, %162 : vector<8x128xf32>
    %164 = vector.extract_strided_slice %155 {offsets = [0, 128], sizes = [8, 128], strides = [1, 1]} : vector<8x384xf32> to vector<8x128xf32>
    %165 = vector.extract_strided_slice %151 {offsets = [0, 128], sizes = [8, 128], strides = [1, 1]} : vector<8x384xf32> to vector<8x128xf32>
    %166 = arith.addf %164, %165 : vector<8x128xf32>
    %167 = arith.negf %166 : vector<8x128xf32>
    %168 = math.exp %167 : vector<8x128xf32>
    %cst_48 = arith.constant 1.000000e+00 : f32
    %169 = vector.broadcast %cst_48 : f32 to vector<8x128xf32>
    %170 = arith.addf %169, %168 : vector<8x128xf32>
    %171 = arith.divf %169, %170 : vector<8x128xf32>
    %172 = vector.extract_strided_slice %155 {offsets = [0, 256], sizes = [8, 128], strides = [1, 1]} : vector<8x384xf32> to vector<8x128xf32>
    %173 = vector.extract_strided_slice %151 {offsets = [0, 256], sizes = [8, 128], strides = [1, 1]} : vector<8x384xf32> to vector<8x128xf32>
    %174 = arith.mulf %163, %173 : vector<8x128xf32>
    %175 = arith.addf %172, %174 : vector<8x128xf32>
    %176 = math.tanh %175 : vector<8x128xf32>
    %cst_49 = arith.constant 1.000000e+00 : f32
    %177 = vector.broadcast %cst_49 : f32 to vector<8x128xf32>
    %178 = arith.subf %177, %171 : vector<8x128xf32>
    %179 = arith.mulf %178, %176 : vector<8x128xf32>
    %180 = arith.mulf %171, %147 : vector<8x128xf32>
    %181 = arith.addf %179, %180 : vector<8x128xf32>
    %c5_i32 = arith.constant 5 : i32
    %182 = arith.truncf %181 : vector<8x128xf32> to vector<8x128xbf16>
    %c0_50 = arith.constant 0 : index
    %c0_51 = arith.constant 0 : index
    %183 = vector.load %arg4[%c0_50, %c0_51] : memref<128x384xbf16, #tpu.memory_space<vmem>>, vector<128x384xbf16>
    %cst_52 = arith.constant dense<0.000000e+00> : vector<8x384xf32>
    %184 = tpu.matmul %182, %183, %cst_52 {dimension_numbers = #tpu.dot_dimension_numbers<[1], [0], [0], [1], [0, 0, 1, 1], [], []>} : vector<8x128xbf16>, vector<128x384xbf16>, vector<8x384xf32> -> vector<8x384xf32>
    %185 = arith.addf %184, %10 : vector<8x384xf32>
    %c8_i32_53 = arith.constant 8 : i32
    %186 = arith.muli %c5_i32, %c8_i32_53 : i32
    %187 = tpu.assume_multiple %186, 8 : i32
    %188 = arith.index_cast %187 : i32 to index
    %c0_54 = arith.constant 0 : index
    %189 = vector.load %arg9[%188, %c0_54] : memref<64x384xf32, #tpu.memory_space<vmem>>, vector<8x384xf32>
    %190 = vector.extract_strided_slice %189 {offsets = [0, 0], sizes = [8, 128], strides = [1, 1]} : vector<8x384xf32> to vector<8x128xf32>
    %191 = vector.extract_strided_slice %185 {offsets = [0, 0], sizes = [8, 128], strides = [1, 1]} : vector<8x384xf32> to vector<8x128xf32>
    %192 = arith.addf %190, %191 : vector<8x128xf32>
    %193 = arith.negf %192 : vector<8x128xf32>
    %194 = math.exp %193 : vector<8x128xf32>
    %cst_55 = arith.constant 1.000000e+00 : f32
    %195 = vector.broadcast %cst_55 : f32 to vector<8x128xf32>
    %196 = arith.addf %195, %194 : vector<8x128xf32>
    %197 = arith.divf %195, %196 : vector<8x128xf32>
    %198 = vector.extract_strided_slice %189 {offsets = [0, 128], sizes = [8, 128], strides = [1, 1]} : vector<8x384xf32> to vector<8x128xf32>
    %199 = vector.extract_strided_slice %185 {offsets = [0, 128], sizes = [8, 128], strides = [1, 1]} : vector<8x384xf32> to vector<8x128xf32>
    %200 = arith.addf %198, %199 : vector<8x128xf32>
    %201 = arith.negf %200 : vector<8x128xf32>
    %202 = math.exp %201 : vector<8x128xf32>
    %cst_56 = arith.constant 1.000000e+00 : f32
    %203 = vector.broadcast %cst_56 : f32 to vector<8x128xf32>
    %204 = arith.addf %203, %202 : vector<8x128xf32>
    %205 = arith.divf %203, %204 : vector<8x128xf32>
    %206 = vector.extract_strided_slice %189 {offsets = [0, 256], sizes = [8, 128], strides = [1, 1]} : vector<8x384xf32> to vector<8x128xf32>
    %207 = vector.extract_strided_slice %185 {offsets = [0, 256], sizes = [8, 128], strides = [1, 1]} : vector<8x384xf32> to vector<8x128xf32>
    %208 = arith.mulf %197, %207 : vector<8x128xf32>
    %209 = arith.addf %206, %208 : vector<8x128xf32>
    %210 = math.tanh %209 : vector<8x128xf32>
    %cst_57 = arith.constant 1.000000e+00 : f32
    %211 = vector.broadcast %cst_57 : f32 to vector<8x128xf32>
    %212 = arith.subf %211, %205 : vector<8x128xf32>
    %213 = arith.mulf %212, %210 : vector<8x128xf32>
    %214 = arith.mulf %205, %181 : vector<8x128xf32>
    %215 = arith.addf %213, %214 : vector<8x128xf32>
    %c6_i32 = arith.constant 6 : i32
    %216 = arith.truncf %215 : vector<8x128xf32> to vector<8x128xbf16>
    %c0_58 = arith.constant 0 : index
    %c0_59 = arith.constant 0 : index
    %217 = vector.load %arg4[%c0_58, %c0_59] : memref<128x384xbf16, #tpu.memory_space<vmem>>, vector<128x384xbf16>
    %cst_60 = arith.constant dense<0.000000e+00> : vector<8x384xf32>
    %218 = tpu.matmul %216, %217, %cst_60 {dimension_numbers = #tpu.dot_dimension_numbers<[1], [0], [0], [1], [0, 0, 1, 1], [], []>} : vector<8x128xbf16>, vector<128x384xbf16>, vector<8x384xf32> -> vector<8x384xf32>
    %219 = arith.addf %218, %10 : vector<8x384xf32>
    %c8_i32_61 = arith.constant 8 : i32
    %220 = arith.muli %c6_i32, %c8_i32_61 : i32
    %221 = tpu.assume_multiple %220, 8 : i32
    %222 = arith.index_cast %221 : i32 to index
    %c0_62 = arith.constant 0 : index
    %223 = vector.load %arg9[%222, %c0_62] : memref<64x384xf32, #tpu.memory_space<vmem>>, vector<8x384xf32>
    %224 = vector.extract_strided_slice %223 {offsets = [0, 0], sizes = [8, 128], strides = [1, 1]} : vector<8x384xf32> to vector<8x128xf32>
    %225 = vector.extract_strided_slice %219 {offsets = [0, 0], sizes = [8, 128], strides = [1, 1]} : vector<8x384xf32> to vector<8x128xf32>
    %226 = arith.addf %224, %225 : vector<8x128xf32>
    %227 = arith.negf %226 : vector<8x128xf32>
    %228 = math.exp %227 : vector<8x128xf32>
    %cst_63 = arith.constant 1.000000e+00 : f32
    %229 = vector.broadcast %cst_63 : f32 to vector<8x128xf32>
    %230 = arith.addf %229, %228 : vector<8x128xf32>
    %231 = arith.divf %229, %230 : vector<8x128xf32>
    %232 = vector.extract_strided_slice %223 {offsets = [0, 128], sizes = [8, 128], strides = [1, 1]} : vector<8x384xf32> to vector<8x128xf32>
    %233 = vector.extract_strided_slice %219 {offsets = [0, 128], sizes = [8, 128], strides = [1, 1]} : vector<8x384xf32> to vector<8x128xf32>
    %234 = arith.addf %232, %233 : vector<8x128xf32>
    %235 = arith.negf %234 : vector<8x128xf32>
    %236 = math.exp %235 : vector<8x128xf32>
    %cst_64 = arith.constant 1.000000e+00 : f32
    %237 = vector.broadcast %cst_64 : f32 to vector<8x128xf32>
    %238 = arith.addf %237, %236 : vector<8x128xf32>
    %239 = arith.divf %237, %238 : vector<8x128xf32>
    %240 = vector.extract_strided_slice %223 {offsets = [0, 256], sizes = [8, 128], strides = [1, 1]} : vector<8x384xf32> to vector<8x128xf32>
    %241 = vector.extract_strided_slice %219 {offsets = [0, 256], sizes = [8, 128], strides = [1, 1]} : vector<8x384xf32> to vector<8x128xf32>
    %242 = arith.mulf %231, %241 : vector<8x128xf32>
    %243 = arith.addf %240, %242 : vector<8x128xf32>
    %244 = math.tanh %243 : vector<8x128xf32>
    %cst_65 = arith.constant 1.000000e+00 : f32
    %245 = vector.broadcast %cst_65 : f32 to vector<8x128xf32>
    %246 = arith.subf %245, %239 : vector<8x128xf32>
    %247 = arith.mulf %246, %244 : vector<8x128xf32>
    %248 = arith.mulf %239, %215 : vector<8x128xf32>
    %249 = arith.addf %247, %248 : vector<8x128xf32>
    %c7_i32 = arith.constant 7 : i32
    %250 = arith.truncf %249 : vector<8x128xf32> to vector<8x128xbf16>
    %c0_66 = arith.constant 0 : index
    %c0_67 = arith.constant 0 : index
    %251 = vector.load %arg4[%c0_66, %c0_67] : memref<128x384xbf16, #tpu.memory_space<vmem>>, vector<128x384xbf16>
    %cst_68 = arith.constant dense<0.000000e+00> : vector<8x384xf32>
    %252 = tpu.matmul %250, %251, %cst_68 {dimension_numbers = #tpu.dot_dimension_numbers<[1], [0], [0], [1], [0, 0, 1, 1], [], []>} : vector<8x128xbf16>, vector<128x384xbf16>, vector<8x384xf32> -> vector<8x384xf32>
    %253 = arith.addf %252, %10 : vector<8x384xf32>
    %c8_i32_69 = arith.constant 8 : i32
    %254 = arith.muli %c7_i32, %c8_i32_69 : i32
    %255 = tpu.assume_multiple %254, 8 : i32
    %256 = arith.index_cast %255 : i32 to index
    %c0_70 = arith.constant 0 : index
    %257 = vector.load %arg9[%256, %c0_70] : memref<64x384xf32, #tpu.memory_space<vmem>>, vector<8x384xf32>
    %258 = vector.extract_strided_slice %257 {offsets = [0, 0], sizes = [8, 128], strides = [1, 1]} : vector<8x384xf32> to vector<8x128xf32>
    %259 = vector.extract_strided_slice %253 {offsets = [0, 0], sizes = [8, 128], strides = [1, 1]} : vector<8x384xf32> to vector<8x128xf32>
    %260 = arith.addf %258, %259 : vector<8x128xf32>
    %261 = arith.negf %260 : vector<8x128xf32>
    %262 = math.exp %261 : vector<8x128xf32>
    %cst_71 = arith.constant 1.000000e+00 : f32
    %263 = vector.broadcast %cst_71 : f32 to vector<8x128xf32>
    %264 = arith.addf %263, %262 : vector<8x128xf32>
    %265 = arith.divf %263, %264 : vector<8x128xf32>
    %266 = vector.extract_strided_slice %257 {offsets = [0, 128], sizes = [8, 128], strides = [1, 1]} : vector<8x384xf32> to vector<8x128xf32>
    %267 = vector.extract_strided_slice %253 {offsets = [0, 128], sizes = [8, 128], strides = [1, 1]} : vector<8x384xf32> to vector<8x128xf32>
    %268 = arith.addf %266, %267 : vector<8x128xf32>
    %269 = arith.negf %268 : vector<8x128xf32>
    %270 = math.exp %269 : vector<8x128xf32>
    %cst_72 = arith.constant 1.000000e+00 : f32
    %271 = vector.broadcast %cst_72 : f32 to vector<8x128xf32>
    %272 = arith.addf %271, %270 : vector<8x128xf32>
    %273 = arith.divf %271, %272 : vector<8x128xf32>
    %274 = vector.extract_strided_slice %257 {offsets = [0, 256], sizes = [8, 128], strides = [1, 1]} : vector<8x384xf32> to vector<8x128xf32>
    %275 = vector.extract_strided_slice %253 {offsets = [0, 256], sizes = [8, 128], strides = [1, 1]} : vector<8x384xf32> to vector<8x128xf32>
    %276 = arith.mulf %265, %275 : vector<8x128xf32>
    %277 = arith.addf %274, %276 : vector<8x128xf32>
    %278 = math.tanh %277 : vector<8x128xf32>
    %cst_73 = arith.constant 1.000000e+00 : f32
    %279 = vector.broadcast %cst_73 : f32 to vector<8x128xf32>
    %280 = arith.subf %279, %273 : vector<8x128xf32>
    %281 = arith.mulf %280, %278 : vector<8x128xf32>
    %282 = arith.mulf %273, %249 : vector<8x128xf32>
    %283 = arith.addf %281, %282 : vector<8x128xf32>
    %c8_i32_74 = arith.constant 8 : i32
    %284 = arith.truncf %283 : vector<8x128xf32> to vector<8x128xbf16>
    %c0_75 = arith.constant 0 : index
    %c0_76 = arith.constant 0 : index
    %285 = vector.load %arg6[%c0_75, %c0_76] : memref<128x128xbf16, #tpu.memory_space<vmem>>, vector<128x128xbf16>
    %cst_77 = arith.constant dense<0.000000e+00> : vector<8x128xf32>
    %286 = tpu.matmul %284, %285, %cst_77 {dimension_numbers = #tpu.dot_dimension_numbers<[1], [0], [0], [1], [0, 0, 1, 1], [], []>} : vector<8x128xbf16>, vector<128x128xbf16>, vector<8x128xf32> -> vector<8x128xf32>
    %c0_78 = arith.constant 0 : index
    %c0_79 = arith.constant 0 : index
    %287 = vector.load %arg7[%c0_78, %c0_79] : memref<1x128xf32, #tpu.memory_space<vmem>>, vector<1x128xf32>
    %288 = vector.broadcast %287 : vector<1x128xf32> to vector<8x128xf32>
    %289 = arith.addf %286, %288 : vector<8x128xf32>
    %c0_80 = arith.constant 0 : index
    %c0_81 = arith.constant 0 : index
    %290 = vector.load %arg8[%c0_80, %c0_81] : memref<8x128xf32, #tpu.memory_space<vmem>>, vector<8x128xf32>
    tpu.vector_store %arg8[%c0_80, %c0_81], %289 {strides = array<i32>} : memref<8x128xf32, #tpu.memory_space<vmem>>, vector<8x128xf32>,
    return
  }
  func.func @transform_0(%arg0: i32) -> (i32, i32, i32) {
    %c0_i32 = arith.constant 0 : i32
    %c0_i32_0 = arith.constant 0 : i32
    %c0_i32_1 = arith.constant 0 : i32
    return %c0_i32, %arg0, %c0_i32_0 : i32, i32, i32
  }
  func.func @transform_1(%arg0: i32) -> (i32, i32) {
    %c0_i32 = arith.constant 0 : i32
    %c0_i32_0 = arith.constant 0 : i32
    %c0_i32_1 = arith.constant 0 : i32
    return %c0_i32, %c0_i32_0 : i32, i32
  }
  func.func @transform_2(%arg0: i32) -> (i32, i32) {
    %c0_i32 = arith.constant 0 : i32
    %c0_i32_0 = arith.constant 0 : i32
    %c0_i32_1 = arith.constant 0 : i32
    return %c0_i32, %c0_i32_0 : i32, i32
  }
  func.func @transform_3(%arg0: i32) -> (i32, i32) {
    %c0_i32 = arith.constant 0 : i32
    %c0_i32_0 = arith.constant 0 : i32
    %c0_i32_1 = arith.constant 0 : i32
    return %c0_i32, %c0_i32_0 : i32, i32
  }
  func.func @transform_4(%arg0: i32) -> (i32, i32) {
    %c0_i32 = arith.constant 0 : i32
    %c0_i32_0 = arith.constant 0 : i32
    %c0_i32_1 = arith.constant 0 : i32
    return %c0_i32, %c0_i32_0 : i32, i32
  }
  func.func @transform_5(%arg0: i32) -> (i32, i32) {
    %c0_i32 = arith.constant 0 : i32
    %c0_i32_0 = arith.constant 0 : i32
    %c0_i32_1 = arith.constant 0 : i32
    return %c0_i32, %c0_i32_0 : i32, i32
  }
  func.func @transform_6(%arg0: i32) -> (i32, i32) {
    %c0_i32 = arith.constant 0 : i32
    %c0_i32_0 = arith.constant 0 : i32
    %c0_i32_1 = arith.constant 0 : i32
    return %c0_i32, %c0_i32_0 : i32, i32
  }
  func.func @transform_7(%arg0: i32) -> (i32, i32) {
    %c0_i32 = arith.constant 0 : i32
    %c0_i32_0 = arith.constant 0 : i32
    return %arg0, %c0_i32 : i32, i32
  }
}

</mosaic_0001>

<bundles_post_ra>
// kernel: tpu_custom_call.1
= control target key start
LH: loop header
LB: loop body
LE: loop exit
PB: predicated region body
PF: predicated region fallthrough
CT: control target
= control target key end

     0   :  { %12 = vsyncpa [#allocation4], 0  ;;  %s2758_s0 = inlined_call_operand.hbm [shape: bf16[8,8,8], index: 0, kind: input, shape index: {}]   ;;  %s2759_s1 = inlined_call_operand.hbm [shape: bf16[8,384], index: 1, kind: input, shape index: {}]   ;;  %s2760_s2 = inlined_call_operand.vmem [shape: f32[1,384], index: 2, kind: input, shape index: {}]   ;;  %s2761_s3 = inlined_call_operand.hbm [shape: bf16[128,384], index: 3, kind: input, shape index: {}]   ;;  %s2762_s4 = inlined_call_operand.vmem [shape: f32[1,384], index: 4, kind: input, shape index: {}]   ;;  %s2763_s5 = inlined_call_operand.hbm [shape: bf16[128,128], index: 5, kind: input, shape index: {}]   ;;  %s2764_s6 = inlined_call_operand.vmem [shape: f32[1,128], index: 6, kind: input, shape index: {}]   ;;  %s2765_s7 = inlined_call_operand.hbm [shape: f32[8,128], index: 7, kind: output, shape index: {}]  }
   0x1   :  { %13 = vsyncpa [#allocation7], 0 }
   0x2   :  { %14 = vsyncpa [#allocation10], 0 }
   0x3   :  { %15 = vsyncpa [#allocation5], 0  ;;  %s2129_s24 = smov [#allocation6]   ;;  %s2130_s26 = smov [#allocation3]  }
   0x4   :  { %s34_s25 = sshll.u32 %s2129_s24, 4  ;;  %s21_s27 = sshll.u32 %s2130_s26, 4  ;;  %s35_s25 = int_to_ptr.vmem [resolvable:$true] %s34_s25  ;;  %s2181_s27 = int_to_ptr.vmem [resolvable:$true] %s21_s27 }
   0x5   :  { %s2011_s30 = scalar_lea.hbm %s2759_s1, 192 }
   0x6   :  { %p2012_p0 = scmp.ne.s32.totalorder %s2759_s1, %s2011_s30  ;;  %p2015_p1 = scmp.lt.u32.totalorder %s2011_s30, %s2759_s1 }
   0x8   :  { %p2017_p2 = pnand %p2015_p1, %p2012_p0 }
   0xa   :  { %2020 = shalt.err (!%p2017_p2)
}
   0xb   :  { %s2021_s12 = scalar_lea.vmem %s35_s25, 192  ;;  %p2026_p4 = scmp.lt.s32.totalorder %s35_s25, %s35_s25 }
   0xc   :  { %p2022_p3 = scmp.ne.s32.totalorder %s35_s25, %s2021_s12  ;;  %p2027_p5 = scmp.lt.s32.totalorder %s2021_s12, %s2021_s12 }
   0xe   :  { %p2028_p6 = por %p2027_p5, %p2026_p4 }
  0x10   :  { %p2029_p7 = pnand %p2028_p6, %p2022_p3 }
  0x12   :  { %2032 = shalt.err (!%p2029_p7)
}
  0x13   :  { %37 = dma.hbm_to_vmem [thread:$0]  %s2759_s1, 192, %s35_s25, [#allocation7]  }
  0x14   :  { %s2033_s17 = scalar_lea.hbm %s2758_s0, 512 }
  0x15   :  { %p2034_p8 = scmp.ne.s32.totalorder %s2758_s0, %s2033_s17  ;;  %p2037_p9 = scmp.lt.u32.totalorder %s2033_s17, %s2758_s0 }
  0x17   :  { %p2039_p10 = pnand %p2037_p9, %p2034_p8 }
  0x19   :  { %2042 = shalt.err (!%p2039_p10)
}
  0x1a   :  { %s2043_s22 = scalar_lea.vmem %s2181_s27, 512  ;;  %p2048_p12 = scmp.lt.s32.totalorder %s2181_s27, %s2181_s27 }
  0x1b   :  { %p2044_p11 = scmp.ne.s32.totalorder %s2181_s27, %s2043_s22  ;;  %p2049_p13 = scmp.lt.s32.totalorder %s2043_s22, %s2043_s22 }
  0x1d   :  { %p2050_p0 = por %p2049_p13, %p2048_p12 }
  0x1f   :  { %p2051_p1 = pnand %p2050_p0, %p2044_p11 }
  0x21   :  { %2054 = shalt.err (!%p2051_p1)
}
  0x22   :  { %s2131_s1 = smov 64   ;;  %s2132_s23 = smov 4  }
  0x23   :  { %27 = dma.hbm_to_vmem [thread:$0]  %s2758_s0, 512, %s2181_s27, [#allocation4], %s2131_s1, %s2131_s1, %s2132_s23  }
  0x24   :  { %s2133_s26 = smov [#allocation8]   ;;  %s2055_s8 = scalar_lea.hbm %s2761_s3, 3072 }
  0x25   :  { %s45_s28 = sshll.u32 %s2133_s26, 4  ;;  %p2056_p2 = scmp.ne.s32.totalorder %s2761_s3, %s2055_s8  ;;  %s46_s28 = int_to_ptr.vmem [resolvable:$true] %s45_s28 }
  0x26   :  { %p2059_p3 = scmp.lt.u32.totalorder %s2055_s8, %s2761_s3 }
  0x28   :  { %p2061_p4 = pnand %p2059_p3, %p2056_p2 }
  0x2a   :  { %2064 = shalt.err (!%p2061_p4)
}
  0x2b   :  { %s2065_s13 = scalar_lea.vmem %s46_s28, 3072  ;;  %p2070_p6 = scmp.lt.s32.totalorder %s46_s28, %s46_s28 }
  0x2c   :  { %p2066_p5 = scmp.ne.s32.totalorder %s46_s28, %s2065_s13  ;;  %p2071_p7 = scmp.lt.s32.totalorder %s2065_s13, %s2065_s13 }
  0x2e   :  { %p2072_p8 = por %p2071_p7, %p2070_p6 }
  0x30   :  { %p2073_p9 = pnand %p2072_p8, %p2066_p5 }
  0x32   :  { %2076 = shalt.err (!%p2073_p9)
}
  0x33   :  { %s2134_s0 = smov 192   ;;  %s2135_s27 = smov 12  }
  0x34   :  { %51 = dma.hbm_to_vmem [thread:$0]  %s2761_s3, 3072, %s46_s28, [#allocation7], %s2134_s0, %s2134_s0, %s2135_s27  }
  0x35   :  { %s2136_s16 = smov [#allocation9]   ;;  %s2077_s20 = scalar_lea.hbm %s2763_s5, 1024 }
  0x36   :  { %s59_s17 = sshll.u32 %s2136_s16, 4  ;;  %p2078_p10 = scmp.ne.s32.totalorder %s2763_s5, %s2077_s20  ;;  %s60_s17 = int_to_ptr.vmem [resolvable:$true] %s59_s17 }
  0x37   :  { %p2081_p11 = scmp.lt.u32.totalorder %s2077_s20, %s2763_s5 }
  0x39   :  { %p2083_p12 = pnand %p2081_p11, %p2078_p10 }
  0x3b   :  { %2086 = shalt.err (!%p2083_p12)
}
  0x3c   :  { %s2087_s26 = scalar_lea.vmem %s60_s17, 1024  ;;  %p2092_p0 = scmp.lt.s32.totalorder %s60_s17, %s60_s17 }
  0x3d   :  { %p2088_p13 = scmp.ne.s32.totalorder %s60_s17, %s2087_s26  ;;  %p2093_p1 = scmp.lt.s32.totalorder %s2087_s26, %s2087_s26 }
  0x3f   :  { %p2094_p2 = por %p2093_p1, %p2092_p0 }
  0x41   :  { %p2095_p3 = pnand %p2094_p2, %p2088_p13 }
  0x43   :  { %2098 = shalt.err (!%p2095_p3)
}
  0x44   :  { %65 = dma.hbm_to_vmem [thread:$0]  %s2763_s5, 1024, %s60_s17, [#allocation10], %s2131_s1, %s2131_s1, %s2132_s23  }
  0x45   :  { %2121 = dma.done.wait [#allocation4], 512  }
  0x46   :  { %2122 = vsyncadd [#allocation4], 4294966784 }
  0x47   :  { %2123 = dma.done.wait [#allocation7], 3264  }
  0x48   :  { %2124 = vsyncadd [#allocation7], 4294964032 }
  0x49   :  { %2125 = dma.done.wait [#allocation10], 1024  }
  0x4a   :  { %2126 = vsyncadd [#allocation10], 4294966272  ;;  %v2766_v0 = vmov 0   ;;  %v89_v1 = vld [vmem:[#allocation6] sm:$0xff]  ;;  %vm149_vm0 = vcmask 1043456   ;;  %vm136_vm1 = vcmask 64512   ;;  %v93_v36 = vlaneseq }
  0x4b   :  { %191 = vmatprep.mubr.bf16.mxu0 %v2766_v0  ;;  %v1511_v2 = vcombine.high %v89_v1, %v89_v1  ;;  %v1510_v3 = vcombine.low %v89_v1, %v89_v1  ;;  %v1862_v4 = vld [vmem:[#allocation3] sm:$0xff]   ;;  %v2243_v5 = vld [vmem:[#allocation8 + $0x4] ss:$12 sps:$4 sm:$0xff]   ;;  %v2248_v7 = vld [vmem:[#allocation8] ss:$12 sps:$4 sm:$0xff]   ;;  %v2768_v16 = vmov 0.0  }
  0x4c   :  { %1659 = vmatprep.mubr.msk.bf16.mxu1 %vm136_vm1, %v1862_v4  ;;  %v2251_v8 = vld [vmem:[#allocation8 + $0x1c] ss:$12 sps:$4 sm:$0xff]   ;;  %v2255_v9 = vld [vmem:[#allocation8 + $0x18] ss:$12 sps:$4 sm:$0xff]   ;;  %v2259_v10 = vld [vmem:[#allocation8 + $0x34] ss:$12 sps:$4 sm:$0xff]  }
  0x4d   :  { %1513 = vmatprep.subr.msk.bf16.mxu0 %vm149_vm0, %v1511_v2  ;;  %v151_v6 = vsel %vm149_vm0, %v1510_v3, 0  ;;  %v1869_v11 = vld [vmem:[#allocation3 + $0x8] sm:$0xff]   ;;  %v2265_v14 = vld [vmem:[#allocation8 + $0x4c] ss:$12 sps:$4 sm:$0xff]   ;;  %v2271_v17 = vld [vmem:[#allocation8 + $0x8] ss:$12 sps:$4 sm:$0xff]  }
  0x4e   :  { %160 = vmatpush1.bf16.msra.mxu0 %v151_v6  ;;  %v1883_v12 = vld [vmem:[#allocation6 + $0x8] ss:$0 sps:$4 sm:$0xff]   ;;  %v2274_v18 = vld [vmem:[#allocation8 + $0x48] ss:$12 sps:$4 sm:$0xff]   ;;  %v2278_v20 = vld [vmem:[#allocation8 + $0x64] ss:$12 sps:$4 sm:$0xff]  }
  0x4f   :  { %498 = vmatprep.subr.bf16.mxu0 %v2243_v5  ;;  %v2262_v13 = vld [vmem:[#allocation8 + $0x30] ss:$12 sps:$4 sm:$0xff]   ;;  %1847 = vmatprep.subr.msk.bf16.mxu1 %vm149_vm0, %v1883_v12  ;;  %v157_v15 = vsel %vm149_vm0, %v1883_v12, 0  ;;  %v1876_v19 = vld [vmem:[#allocation3 + $0x10] sm:$0xff]   ;;  %v2282_v21 = vld [vmem:[#allocation8 + $0x20] ss:$12 sps:$4 sm:$0xff]  }
  0x50   :  { %1658 = vmatpush3.bf16.msra.mxu1 %v157_v15  ;;  %v2287_v22 = vld [vmem:[#allocation8 + $0x60] ss:$12 sps:$4 sm:$0xff]   ;;  %v2290_v23 = vld [vmem:[#allocation8 + $0x7c] ss:$12 sps:$4 sm:$0xff]   ;;  %v2292_v24 = vld [vmem:[#allocation8 + $0x78] ss:$12 sps:$4 sm:$0xff]  }
  0x51   :  { %1514 = vmatmul.mubr.msk.bf16.vlgmr.msra.gmra.mrb[0].mxu0 %vm136_vm1, %v1862_v4  ;;  %1667 = vmatprep.subr.bf16.mxu1 %v2768_v16  ;;  %v2295_v25 = vld [vmem:[#allocation8 + $0x38] ss:$12 sps:$4 sm:$0xff]   ;;  %v1884_v26 = vld [vmem:[#allocation3 + $0x18] sm:$0xff]   ;;  %v2298_v27 = vld [vmem:[#allocation8 + $0x94] ss:$12 sps:$4 sm:$0xff]   ;;  %vm2139_vm2 = vmmov 0  }
  0x52   :  { %499 = vmatpush1.bf16.msra.mxu0 %v2248_v7  ;;  %201 = vmatprep.mubr.bf16.mxu0 %v2766_v0  ;;  %v2303_v28 = vld [vmem:[#allocation8 + $0x50] ss:$12 sps:$4 sm:$0xff]   ;;  %v2315_v30 = vld [vmem:[#allocation8 + $0xac] ss:$12 sps:$4 sm:$0xff]   ;;  %v2318_v31 = vld [vmem:[#allocation8 + $0x68] ss:$12 sps:$4 sm:$0xff]  }
  0x53   :  { %500 = vmatprep.subr.bf16.mxu0 %v2251_v8  ;;  %1660 = vmatmul.mubr.msk.bf16.vlgmr.msra.gmra.mrb[0].mxu1 %vm136_vm1, %v1869_v11  ;;  %v2307_v29 = vld [vmem:[#allocation8 + $0x90] ss:$12 sps:$4 sm:$0xff]   ;;  %v2323_v32 = vld [vmem:[#allocation8 + $0xa8] ss:$12 sps:$4 sm:$0xff]   ;;  %v2328_v33 = vld [vmem:[#allocation8 + $0x80] ss:$12 sps:$4 sm:$0xff]  }
  0x54   :  { %1668 = vmatpush3.bf16.msra.mxu1 %v2271_v17  ;;  %1663 = vmatprep.mubr.msk.bf16.mxu1 %vm136_vm1, %v1876_v19  ;;  %v2334_v34 = vld [vmem:[#allocation8 + $0x98] ss:$12 sps:$4 sm:$0xff]   ;;  %v2342_v35 = vld [vmem:[#allocation8 + $0xb0] ss:$12 sps:$4 sm:$0xff]   ;;  %v2380_v37 = vshrl.u32 %v93_v36, 7  ;;  %s2140_s30 = smov [#allocation11]  }
  0x55   :  { %1669 = vmatprep.subr.bf16.mxu1 %v2768_v16  ;;  %v91_v39 = vld [vmem:[%s2760_s2] sm:$0x7]  ;;  %s1488_s8 = sshll.u32 %s2140_s30, 4  ;;  %s1489_s8 = int_to_ptr.vmem [resolvable:$true] %s1488_s8 }
  0x56   :  { %501 = vmatpush1.bf16.msra.mxu0 %v2255_v9  ;;  %v95_v38 = vsub.s32 0, %v2380_v37  ;;  %v99_v40 = vsub.s32 1, %v2380_v37  ;;  %v2770_v48 = vsub.s32 2, %v2380_v37  ;;  %s2099_s9 = scalar_lea.vmem %s1489_s8, 128  ;;  %p2104_p5 = scmp.lt.s32.totalorder %s1489_s8, %s1489_s8 }
  0x57   :  { %502 = vmatprep.subr.bf16.mxu0 %v2259_v10  ;;  %p2100_p4 = scmp.ne.s32.totalorder %s1489_s8, %s2099_s9  ;;  %p2105_p6 = scmp.lt.s32.totalorder %s2099_s9, %s2099_s9 }
  0x58   :  { %1670 = vmatpush3.bf16.msra.mxu1 %v2282_v21  ;;  %v96_v42 = vrot.slane %v91_v39, %v95_v38  ;;  %v100_v44 = vrot.slane %v91_v39, %v99_v40  ;;  %v2394_v50 = vrot.slane %v91_v39, %v2770_v48 }
  0x59   :  { %1515 = vmatmul.mubr.msk.bf16.gmra.mrb[4].mxu0 %vm136_vm1, %v1869_v11  ;;  %1671 = vmatprep.subr.bf16.mxu1 %v2768_v16  ;;  %p2106_p7 = por %p2105_p6, %p2104_p5 }
  0x5a   :  { %503 = vmatpush1.bf16.msra.mxu0 %v2262_v13  ;;  %211 = vmatprep.mubr.bf16.mxu0 %v2766_v0 }
  0x5b   :  { %504 = vmatprep.subr.bf16.mxu0 %v2265_v14  ;;  %1664 = vmatmul.mubr.msk.bf16.gmra.mrb[4].mxu1 %vm136_vm1, %v1884_v26  ;;  %p2107_p8 = pnand %p2106_p7, %p2100_p4 }
  0x5c   :  { %1672 = vmatpush3.bf16.msra.mxu1 %v2295_v25  ;;  %1683 = vmatprep.mubr.msk.bf16.mxu1 %vm2139_vm2, %v2768_v16 }
  0x5d   :  { %1673 = vmatprep.subr.bf16.mxu1 %v2768_v16 }
  0x5e   :  { %505 = vmatpush1.bf16.msra.mxu0 %v2274_v18 }
  0x5f   :  { %506 = vmatprep.subr.bf16.mxu0 %v2278_v20 }
  0x60   :  { %1674 = vmatpush3.bf16.msra.mxu1 %v2303_v28 }
  0x61   :  { %1516 = vmatmul.mubr.msk.bf16.gmra.mrb[8].mxu0 %vm136_vm1, %v1876_v19  ;;  %1675 = vmatprep.subr.bf16.mxu1 %v2768_v16 }
  0x62   :  { %507 = vmatpush1.bf16.msra.mxu0 %v2287_v22  ;;  %221 = vmatprep.mubr.bf16.mxu0 %v2766_v0 }
  0x63   :  { %508 = vmatprep.subr.bf16.mxu0 %v2290_v23 }
  0x64   :  { %1676 = vmatpush3.bf16.msra.mxu1 %v2318_v31 }
  0x65   :  { %1677 = vmatprep.subr.bf16.mxu1 %v2768_v16 }
  0x66   :  { %509 = vmatpush1.bf16.msra.mxu0 %v2292_v24 }
  0x67   :  { %510 = vmatprep.subr.bf16.mxu0 %v2298_v27 }
  0x68   :  { %1678 = vmatpush3.bf16.msra.mxu1 %v2328_v33 }
  0x69   :  { %1517 = vmatmul.mubr.msk.bf16.gmra.mrb[12].mxu0 %vm136_vm1, %v1884_v26  ;;  %1679 = vmatprep.subr.bf16.mxu1 %v2768_v16 }
  0x6a   :  { %511 = vmatpush1.bf16.msra.mxu0 %v2307_v29  ;;  %530 = vmatprep.mubr.bf16.mxu0 %v2766_v0 }
  0x6b   :  { %512 = vmatprep.subr.bf16.mxu0 %v2315_v30 }
  0x6c   :  { %1680 = vmatpush3.bf16.msra.mxu1 %v2334_v34 }
  0x6d   :  { %1681 = vmatprep.subr.bf16.mxu1 %v2768_v16 }
  0x6e   :  { %513 = vmatpush1.bf16.msra.mxu0 %v2323_v32 }
  0x6f   :  { %607 = vmatprep.subr.bf16.mxu0 %v2243_v5 }
  0x70   :  { %1682 = vmatpush3.bf16.msra.mxu1 %v2342_v35 }
  0x71   :  { %531 = vmatmul.mubr.bf16.vlgmr.msra.gmra.mrb[16].mxu0 %v2766_v0  ;;  %1687 = vmatprep.subr.bf16.mxu1 %v2768_v16 }
  0x72   :  { %608 = vmatpush1.bf16.msra.mxu0 %v2248_v7  ;;  %639 = vmatprep.mubr.bf16.mxu0 %v2766_v0 }
  0x73   :  { %609 = vmatprep.subr.bf16.mxu0 %v2251_v8  ;;  %1684 = vmatmul.mubr.bf16.vlgmr.msra.gmra.mrb[8].mxu1 %v2766_v0 }
  0x74   :  { %1688 = vmatpush3.bf16.msra.mxu1 %v2271_v17  ;;  %1703 = vmatprep.mubr.msk.bf16.mxu1 %vm2139_vm2, %v2768_v16 }
  0x75   :  { %1689 = vmatprep.subr.bf16.mxu1 %v2768_v16 }
  0x76   :  { %610 = vmatpush1.bf16.msra.mxu0 %v2255_v9 }
  0x77   :  { %611 = vmatprep.subr.bf16.mxu0 %v2259_v10 }
  0x78   :  { %1690 = vmatpush3.bf16.msra.mxu1 %v2282_v21 }
  0x79   :  { %1691 = vmatprep.subr.bf16.mxu1 %v2768_v16 }
  0x7a   :  { %612 = vmatpush1.bf16.msra.mxu0 %v2262_v13 }
  0x7b   :  { %613 = vmatprep.subr.bf16.mxu0 %v2265_v14 }
  0x7c   :  { %1692 = vmatpush3.bf16.msra.mxu1 %v2295_v25 }
  0x7d   :  { %1693 = vmatprep.subr.bf16.mxu1 %v2768_v16 }
  0x7e   :  { %614 = vmatpush1.bf16.msra.mxu0 %v2274_v18 }
  0x7f   :  { %615 = vmatprep.subr.bf16.mxu0 %v2278_v20 }
  0x80   :  { %1694 = vmatpush3.bf16.msra.mxu1 %v2303_v28 }
  0x81   :  { %1695 = vmatprep.subr.bf16.mxu1 %v2768_v16 }
  0x82   :  { %616 = vmatpush1.bf16.msra.mxu0 %v2287_v22 }
  0x83   :  { %617 = vmatprep.subr.bf16.mxu0 %v2290_v23 }
  0x84   :  { %1696 = vmatpush3.bf16.msra.mxu1 %v2318_v31 }
  0x85   :  { %1697 = vmatprep.subr.bf16.mxu1 %v2768_v16 }
  0x86   :  { %618 = vmatpush1.bf16.msra.mxu0 %v2292_v24 }
  0x87   :  { %619 = vmatprep.subr.bf16.mxu0 %v2298_v27 }
  0x88   :  { %1698 = vmatpush3.bf16.msra.mxu1 %v2328_v33 }
  0x89   :  { %1699 = vmatprep.subr.bf16.mxu1 %v2768_v16 }
  0x8a   :  { %620 = vmatpush1.bf16.msra.mxu0 %v2307_v29 }
  0x8b   :  { %621 = vmatprep.subr.bf16.mxu0 %v2315_v30 }
  0x8c   :  { %1700 = vmatpush3.bf16.msra.mxu1 %v2334_v34 }
  0x8d   :  { %1701 = vmatprep.subr.bf16.mxu1 %v2768_v16 }
  0x8e   :  { %622 = vmatpush1.bf16.msra.mxu0 %v2323_v32 }
  0x8f   :  { %716 = vmatprep.subr.bf16.mxu0 %v2243_v5 }
  0x90   :  { %1702 = vmatpush3.bf16.msra.mxu1 %v2342_v35 }
  0x91   :  { %1707 = vmatprep.subr.bf16.mxu1 %v2768_v16 }
 0x124   :  { %v193_v41 = vpop.f32.mrb[0].mxu0 }
 0x125   :  { %v195_v43 = vpop.f32.mrb[1].mxu0 }
 0x126   :  { %v197_v45 = vpop.f32.mrb[2].mxu0  ;;  %v1661_v56 = vpop.f32.mrb[0].mxu1  ;;  %v196_v48 = vadd.f32 %v195_v43, %v100_v44 }
 0x127   :  { %v2387_v46 = vadd.f32 %v197_v45, %v96_v42  ;;  %v199_v47 = vpop.f32.mrb[3].mxu0  ;;  %v2403_v59 = vadd.f32 %v1661_v56, %v2394_v50  ;;  %v266_v60 = vpop.f32.mrb[1].mxu1 }
 0x128   :  { %v2390_v49 = vadd.f32 %v199_v47, %v100_v44  ;;  %v1662_v62 = vpop.f32.mrb[2].mxu1 }
 0x129   :  { %v2408_v63 = vadd.f32 %v1662_v62, %v2394_v50  ;;  %v269_v1 = vpop.f32.mrb[3].mxu1 }
 0x12a   :  { %v2411_v2 = vadd.f32 %v269_v1, %v2394_v50 }
 0x12c   :  { %v203_v51 = vpop.f32.mrb[4].mxu0 }
 0x12d   :  { %v2396_v52 = vadd.f32 %v203_v51, %v96_v42  ;;  %v205_v53 = vpop.f32.mrb[5].mxu0 }
 0x12e   :  { %v2398_v54 = vadd.f32 %v205_v53, %v100_v44  ;;  %v207_v55 = vpop.f32.mrb[6].mxu0  ;;  %v1665_v15 = vpop.f32.mrb[4].mxu1 }
 0x12f   :  { %v2400_v57 = vadd.f32 %v207_v55, %v96_v42  ;;  %v209_v58 = vpop.f32.mrb[7].mxu0  ;;  %v2420_v36 = vadd.f32 %v1665_v15, %v2394_v50  ;;  %v282_v39 = vpop.f32.mrb[5].mxu1 }
 0x130   :  { %v2405_v61 = vadd.f32 %v209_v58, %v100_v44  ;;  %v2425_v47 = vadd.f32 %v282_v39, %v2394_v50  ;;  %v1666_v51 = vpop.f32.mrb[6].mxu1 }
 0x131   :  { %2771 = vst [vmem:[#allocation16_spill] sm:$0xff] %v2420_v36  ;;  %v2428_v53 = vadd.f32 %v1666_v51, %v2394_v50  ;;  %v285_v55 = vpop.f32.mrb[7].mxu1 }
 0x132   :  { %v2431_v56 = vadd.f32 %v285_v55, %v2394_v50 }
 0x133   :  { %2773 = vst [vmem:[#allocation18_spill] sm:$0xff] %v2428_v53 }
 0x134   :  { %v213_v3 = vpop.f32.mrb[8].mxu0  ;;  %2774 = vst [vmem:[#allocation19_spill] sm:$0xff] %v2431_v56 }
 0x135   :  { %v2413_v4 = vadd.f32 %v213_v3, %v96_v42  ;;  %v215_v6 = vpop.f32.mrb[9].mxu0 }
 0x136   :  { %v2415_v11 = vadd.f32 %v215_v6, %v100_v44  ;;  %v217_v12 = vpop.f32.mrb[10].mxu0 }
 0x137   :  { %v2417_v19 = vadd.f32 %v217_v12, %v96_v42  ;;  %v219_v26 = vpop.f32.mrb[11].mxu0  ;;  %v321_v12 = vld [vmem:[%s2762_s4] sm:$0x7] }
 0x138   :  { %v2422_v45 = vadd.f32 %v219_v26, %v100_v44  ;;  %v2444_v51 = vrot.slane %v321_v12, %v95_v38  ;;  %v2446_v55 = vrot.slane %v321_v12, %v99_v40 }
 0x13a   :  { %2772 = vst [vmem:[#allocation17_spill] sm:$0xff] %v2422_v45 }
 0x13c   :  { %v223_v58 = vpop.f32.mrb[12].mxu0 }
 0x13d   :  { %v2433_v62 = vadd.f32 %v223_v58, %v96_v42  ;;  %v225_v1 = vpop.f32.mrb[13].mxu0  ;;  %v194_v58 = vadd.f32 %v193_v41, %v96_v42 }
 0x13e   :  { %v2435_v3 = vadd.f32 %v225_v1, %v100_v44  ;;  %v227_v6 = vpop.f32.mrb[14].mxu0 }
 0x13f   :  { %2775 = vst [vmem:[#allocation20_spill] sm:$0xff] %v2433_v62  ;;  %v2440_v15 = vadd.f32 %v227_v6, %v96_v42  ;;  %v229_v26 = vpop.f32.mrb[15].mxu0 }
 0x140   :  { %2776 = vst [vmem:[#allocation21_spill] sm:$0xff] %v2435_v3  ;;  %v2442_v39 = vadd.f32 %v229_v26, %v100_v44 }
 0x141   :  { %2777 = vst [vmem:[#allocation22_spill] sm:$0xff] %v2440_v15 }
 0x142   :  { %2778 = vst [vmem:[#allocation23_spill] sm:$0xff] %v2442_v39 }
 0x144   :  { %v532_v0 = vpop.f32.mrb[16].mxu0 }
 0x145   :  { %v533_v16 = vadd.f32 %v532_v0, %v2444_v51  ;;  %v534_v1 = vpop.f32.mrb[17].mxu0  ;;  %v2779_v0 = vsub.s32 2, %v2380_v37 }
 0x146   :  { %v535_v53 = vadd.f32 %v534_v1, %v2446_v55  ;;  %v536_v36 = vpop.f32.mrb[18].mxu0  ;;  %v573_v39 = vpop.f32.mrb[8].mxu1 }
 0x147   :  { %v585_v3 = vadd.f32 %v533_v16, %v194_v58  ;;  %v537_v62 = vpop.f32.mrb[19].mxu0  ;;  %v1685_v38 = vpop.f32.mrb[9].mxu1  ;;  %v2452_v42 = vrot.slane %v321_v12, %v2779_v0  ;;  %v267_v36 = vadd.f32 %v266_v60, %v2394_v50  ;;  %v2780_v50 = vmov 0.0  }
 0x148   :  { %v592_v6 = vadd.f32 %v535_v53, %v196_v48  ;;  %v576_v56 = vpop.f32.mrb[10].mxu1  ;;  %v2781_v60 = vmov 0  }
 0x149   :  { %v1546_v15 = vmul.f32 -1.442695, %v585_v3  ;;  %v1686_v40 = vpop.f32.mrb[11].mxu1  ;;  %v574_v16 = vadd.f32 %v573_v39, %v2452_v42 }
 0x14a   :  { %v1547_v26 = vmul.f32 -1.442695, %v592_v6 }
 0x14b   :  { %1907 = vpow2.f32 %v1546_v15 }
 0x14c   :  { %1909 = vpow2.f32 %v1547_v26 }
 0x155   :  { %v1908_v45 = vpop.eup %1907 }
 0x156   :  { %v589_v41 = vadd.f32 1.0, %v1908_v45  ;;  %v1910_v43 = vpop.eup %1909 }
 0x157   :  { %v596_v44 = vadd.f32 1.0, %v1910_v43 }
 0x158   :  { %1911 = vrcp.f32 %v589_v41 }
 0x159   :  { %1913 = vrcp.f32 %v596_v44 }
 0x162   :  { %v1912_v48 = vpop.eup %1911 }
 0x163   :  { %v599_v53 = vmul.f32 %v1912_v48, %v574_v16  ;;  %v1914_v56 = vpop.eup %1913 }
 0x164   :  { %v602_v3 = vsub.f32 1.0, %v1914_v56  ;;  %v604_v58 = vmul.f32 0.0, %v1914_v56 }
 0x165   :  { %v600_v62 = vadd.f32 %v599_v53, %v267_v36 }
 0x167   :  { %1915 = vtanh.f32 %v600_v62 }
 0x171   :  { %v1916_v15 = vpop.eup %1915 }
 0x172   :  { %v603_v45 = vmul.f32 %v1916_v15, %v602_v3 }
 0x174   :  { %v2456_v1 = vadd.f32 %v604_v58, %v603_v45 }
 0x176   :  { %v606_v37 = vpack.c.bf16 %v2456_v1, %v2456_v1 }
 0x178   :  { %640 = vmatmul.mubr.bf16.vlgmr.msra.gmra.mrb[20].mxu0 %v606_v37  ;;  %1704 = vmatmul.mubr.bf16.vlgmr.msra.gmra.mrb[12].mxu1 %v606_v37 }
 0x179   :  { %717 = vmatpush1.bf16.msra.mxu0 %v2248_v7  ;;  %1708 = vmatpush3.bf16.msra.mxu1 %v2271_v17 }
 0x17a   :  { %718 = vmatprep.subr.bf16.mxu0 %v2251_v8  ;;  %1709 = vmatprep.subr.bf16.mxu1 %v2780_v50 }
 0x17b   :  { %748 = vmatprep.mubr.bf16.mxu0 %v2781_v60  ;;  %1723 = vmatprep.mubr.msk.bf16.mxu1 %vm2139_vm2, %v2780_v50 }
 0x17d   :  { %719 = vmatpush1.bf16.msra.mxu0 %v2255_v9  ;;  %1710 = vmatpush3.bf16.msra.mxu1 %v2282_v21 }
 0x17e   :  { %720 = vmatprep.subr.bf16.mxu0 %v2259_v10  ;;  %1711 = vmatprep.subr.bf16.mxu1 %v2780_v50 }
 0x181   :  { %721 = vmatpush1.bf16.msra.mxu0 %v2262_v13  ;;  %1712 = vmatpush3.bf16.msra.mxu1 %v2295_v25 }
 0x182   :  { %722 = vmatprep.subr.bf16.mxu0 %v2265_v14  ;;  %1713 = vmatprep.subr.bf16.mxu1 %v2780_v50 }
 0x185   :  { %723 = vmatpush1.bf16.msra.mxu0 %v2274_v18  ;;  %1714 = vmatpush3.bf16.msra.mxu1 %v2303_v28 }
 0x186   :  { %724 = vmatprep.subr.bf16.mxu0 %v2278_v20  ;;  %1715 = vmatprep.subr.bf16.mxu1 %v2780_v50 }
 0x189   :  { %725 = vmatpush1.bf16.msra.mxu0 %v2287_v22  ;;  %1716 = vmatpush3.bf16.msra.mxu1 %v2318_v31 }
 0x18a   :  { %726 = vmatprep.subr.bf16.mxu0 %v2290_v23  ;;  %1717 = vmatprep.subr.bf16.mxu1 %v2780_v50 }
 0x18d   :  { %727 = vmatpush1.bf16.msra.mxu0 %v2292_v24  ;;  %1718 = vmatpush3.bf16.msra.mxu1 %v2328_v33 }
 0x18e   :  { %728 = vmatprep.subr.bf16.mxu0 %v2298_v27  ;;  %1719 = vmatprep.subr.bf16.mxu1 %v2780_v50 }
 0x191   :  { %729 = vmatpush1.bf16.msra.mxu0 %v2307_v29  ;;  %1720 = vmatpush3.bf16.msra.mxu1 %v2334_v34 }
 0x192   :  { %730 = vmatprep.subr.bf16.mxu0 %v2315_v30  ;;  %1721 = vmatprep.subr.bf16.mxu1 %v2780_v50 }
 0x195   :  { %731 = vmatpush1.bf16.msra.mxu0 %v2323_v32  ;;  %1722 = vmatpush3.bf16.msra.mxu1 %v2342_v35 }
 0x196   :  { %825 = vmatprep.subr.bf16.mxu0 %v2243_v5  ;;  %1727 = vmatprep.subr.bf16.mxu1 %v2780_v50 }
 0x24b   :  { %v641_v12 = vpop.f32.mrb[20].mxu0  ;;  %v682_v39 = vpop.f32.mrb[12].mxu1 }
 0x24c   :  { %v642_v6 = vadd.f32 %v641_v12, %v2444_v51  ;;  %v643_v26 = vpop.f32.mrb[21].mxu0  ;;  %v1705_v38 = vpop.f32.mrb[13].mxu1  ;;  %v683_v45 = vadd.f32 %v682_v39, %v2452_v42 }
 0x24d   :  { %v644_v40 = vadd.f32 %v643_v26, %v2446_v55  ;;  %v645_v41 = vpop.f32.mrb[22].mxu0  ;;  %v685_v0 = vpop.f32.mrb[14].mxu1 }
 0x24e   :  { %v694_v43 = vadd.f32 %v642_v6, %v2387_v46  ;;  %v646_v44 = vpop.f32.mrb[23].mxu0  ;;  %v1706_v16 = vpop.f32.mrb[15].mxu1 }
 0x24f   :  { %v701_v48 = vadd.f32 %v644_v40, %v2390_v49 }
 0x250   :  { %v1548_v36 = vmul.f32 -1.442695, %v694_v43 }
 0x251   :  { %v1549_v53 = vmul.f32 -1.442695, %v701_v48 }
 0x252   :  { %1917 = vpow2.f32 %v1548_v36 }
 0x253   :  { %1919 = vpow2.f32 %v1549_v53 }
 0x25c   :  { %v1918_v62 = vpop.eup %1917 }
 0x25d   :  { %v698_v56 = vadd.f32 1.0, %v1918_v62  ;;  %v1920_v3 = vpop.eup %1919 }
 0x25e   :  { %v705_v15 = vadd.f32 1.0, %v1920_v3 }
 0x25f   :  { %1921 = vrcp.f32 %v698_v56 }
 0x260   :  { %1923 = vrcp.f32 %v705_v15 }
 0x269   :  { %v1922_v58 = vpop.eup %1921 }
 0x26a   :  { %v708_v37 = vmul.f32 %v1922_v58, %v683_v45  ;;  %v1924_v12 = vpop.eup %1923 }
 0x26b   :  { %v711_v6 = vsub.f32 1.0, %v1924_v12  ;;  %v713_v38 = vmul.f32 %v1924_v12, %v2456_v1 }
 0x26c   :  { %v709_v46 = vadd.f32 %v708_v37, %v2411_v2 }
 0x26e   :  { %1925 = vtanh.f32 %v709_v46 }
 0x278   :  { %v1926_v49 = vpop.eup %1925 }
 0x279   :  { %v712_v26 = vmul.f32 %v1926_v49, %v711_v6 }
 0x27b   :  { %v2502_v40 = vadd.f32 %v713_v38, %v712_v26 }
 0x27d   :  { %v715_v41 = vpack.c.bf16 %v2502_v40, %v2502_v40 }
 0x27f   :  { %749 = vmatmul.mubr.bf16.vlgmr.msra.gmra.mrb[24].mxu0 %v715_v41  ;;  %1724 = vmatmul.mubr.bf16.vlgmr.msra.gmra.mrb[16].mxu1 %v715_v41 }
 0x280   :  { %826 = vmatpush1.bf16.msra.mxu0 %v2248_v7  ;;  %1728 = vmatpush3.bf16.msra.mxu1 %v2271_v17 }
 0x281   :  { %827 = vmatprep.subr.bf16.mxu0 %v2251_v8  ;;  %1729 = vmatprep.subr.bf16.mxu1 %v2780_v50 }
 0x282   :  { %857 = vmatprep.mubr.bf16.mxu0 %v2781_v60  ;;  %1743 = vmatprep.mubr.msk.bf16.mxu1 %vm2139_vm2, %v2780_v50 }
 0x284   :  { %828 = vmatpush1.bf16.msra.mxu0 %v2255_v9  ;;  %1730 = vmatpush3.bf16.msra.mxu1 %v2282_v21 }
 0x285   :  { %829 = vmatprep.subr.bf16.mxu0 %v2259_v10  ;;  %1731 = vmatprep.subr.bf16.mxu1 %v2780_v50 }
 0x288   :  { %830 = vmatpush1.bf16.msra.mxu0 %v2262_v13  ;;  %1732 = vmatpush3.bf16.msra.mxu1 %v2295_v25 }
 0x289   :  { %831 = vmatprep.subr.bf16.mxu0 %v2265_v14  ;;  %1733 = vmatprep.subr.bf16.mxu1 %v2780_v50 }
 0x28c   :  { %832 = vmatpush1.bf16.msra.mxu0 %v2274_v18  ;;  %1734 = vmatpush3.bf16.msra.mxu1 %v2303_v28 }
 0x28d   :  { %833 = vmatprep.subr.bf16.mxu0 %v2278_v20  ;;  %1735 = vmatprep.subr.bf16.mxu1 %v2780_v50 }
 0x290   :  { %834 = vmatpush1.bf16.msra.mxu0 %v2287_v22  ;;  %1736 = vmatpush3.bf16.msra.mxu1 %v2318_v31 }
 0x291   :  { %835 = vmatprep.subr.bf16.mxu0 %v2290_v23  ;;  %1737 = vmatprep.subr.bf16.mxu1 %v2780_v50 }
 0x294   :  { %836 = vmatpush1.bf16.msra.mxu0 %v2292_v24  ;;  %1738 = vmatpush3.bf16.msra.mxu1 %v2328_v33 }
 0x295   :  { %837 = vmatprep.subr.bf16.mxu0 %v2298_v27  ;;  %1739 = vmatprep.subr.bf16.mxu1 %v2780_v50 }
 0x298   :  { %838 = vmatpush1.bf16.msra.mxu0 %v2307_v29  ;;  %1740 = vmatpush3.bf16.msra.mxu1 %v2334_v34 }
 0x299   :  { %839 = vmatprep.subr.bf16.mxu0 %v2315_v30  ;;  %1741 = vmatprep.subr.bf16.mxu1 %v2780_v50 }
 0x29c   :  { %840 = vmatpush1.bf16.msra.mxu0 %v2323_v32  ;;  %1742 = vmatpush3.bf16.msra.mxu1 %v2342_v35 }
 0x29d   :  { %934 = vmatprep.subr.bf16.mxu0 %v2243_v5  ;;  %1747 = vmatprep.subr.bf16.mxu1 %v2780_v50 }
 0x352   :  { %v750_v2 = vpop.f32.mrb[24].mxu0  ;;  %v791_v1 = vpop.f32.mrb[16].mxu1 }
 0x353   :  { %v751_v39 = vadd.f32 %v750_v2, %v2444_v51  ;;  %v752_v0 = vpop.f32.mrb[25].mxu0  ;;  %v1725_v43 = vpop.f32.mrb[17].mxu1  ;;  %v792_v12 = vadd.f32 %v791_v1, %v2452_v42 }
 0x354   :  { %v753_v44 = vadd.f32 %v752_v0, %v2446_v55  ;;  %v754_v16 = vpop.f32.mrb[26].mxu0  ;;  %v794_v48 = vpop.f32.mrb[18].mxu1 }
 0x355   :  { %v803_v36 = vadd.f32 %v751_v39, %v2396_v52  ;;  %v755_v53 = vpop.f32.mrb[27].mxu0  ;;  %v1726_v62 = vpop.f32.mrb[19].mxu1 }
 0x356   :  { %v810_v56 = vadd.f32 %v753_v44, %v2398_v54 }
 0x357   :  { %v1550_v3 = vmul.f32 -1.442695, %v803_v36 }
 0x358   :  { %v1551_v15 = vmul.f32 -1.442695, %v810_v56 }
 0x359   :  { %1927 = vpow2.f32 %v1550_v3 }
 0x35a   :  { %1929 = vpow2.f32 %v1551_v15 }
 0x363   :  { %v1928_v45 = vpop.eup %1927 }
 0x364   :  { %v807_v58 = vadd.f32 1.0, %v1928_v45  ;;  %v1930_v37 = vpop.eup %1929 }
 0x365   :  { %v814_v46 = vadd.f32 1.0, %v1930_v37 }
 0x366   :  { %1931 = vrcp.f32 %v807_v58 }
 0x367   :  { %1933 = vrcp.f32 %v814_v46 }
 0x370   :  { %v1932_v6 = vpop.eup %1931 }
 0x371   :  { %v817_v49 = vmul.f32 %v1932_v6, %v792_v12  ;;  %v1934_v26 = vpop.eup %1933 }
 0x372   :  { %v820_v38 = vsub.f32 1.0, %v1934_v26  ;;  %v822_v2 = vmul.f32 %v1934_v26, %v2502_v40 }
 0x373   :  { %v818_v52 = vadd.f32 %v817_v49, %v2403_v59 }
 0x375   :  { %1935 = vtanh.f32 %v818_v52 }
 0x37f   :  { %v1936_v54 = vpop.eup %1935 }
 0x380   :  { %v821_v41 = vmul.f32 %v1936_v54, %v820_v38 }
 0x382   :  { %v2548_v39 = vadd.f32 %v822_v2, %v821_v41 }
 0x384   :  { %v824_v0 = vpack.c.bf16 %v2548_v39, %v2548_v39 }
 0x386   :  { %858 = vmatmul.mubr.bf16.vlgmr.msra.gmra.mrb[28].mxu0 %v824_v0  ;;  %1744 = vmatmul.mubr.bf16.vlgmr.msra.gmra.mrb[20].mxu1 %v824_v0 }
 0x387   :  { %935 = vmatpush1.bf16.msra.mxu0 %v2248_v7  ;;  %1748 = vmatpush3.bf16.msra.mxu1 %v2271_v17 }
 0x388   :  { %936 = vmatprep.subr.bf16.mxu0 %v2251_v8  ;;  %1749 = vmatprep.subr.bf16.mxu1 %v2780_v50 }
 0x389   :  { %966 = vmatprep.mubr.bf16.mxu0 %v2781_v60  ;;  %1763 = vmatprep.mubr.msk.bf16.mxu1 %vm2139_vm2, %v2780_v50 }
 0x38b   :  { %937 = vmatpush1.bf16.msra.mxu0 %v2255_v9  ;;  %1750 = vmatpush3.bf16.msra.mxu1 %v2282_v21 }
 0x38c   :  { %938 = vmatprep.subr.bf16.mxu0 %v2259_v10  ;;  %1751 = vmatprep.subr.bf16.mxu1 %v2780_v50 }
 0x38f   :  { %939 = vmatpush1.bf16.msra.mxu0 %v2262_v13  ;;  %1752 = vmatpush3.bf16.msra.mxu1 %v2295_v25 }
 0x390   :  { %940 = vmatprep.subr.bf16.mxu0 %v2265_v14  ;;  %1753 = vmatprep.subr.bf16.mxu1 %v2780_v50 }
 0x393   :  { %941 = vmatpush1.bf16.msra.mxu0 %v2274_v18  ;;  %1754 = vmatpush3.bf16.msra.mxu1 %v2303_v28 }
 0x394   :  { %942 = vmatprep.subr.bf16.mxu0 %v2278_v20  ;;  %1755 = vmatprep.subr.bf16.mxu1 %v2780_v50 }
 0x397   :  { %943 = vmatpush1.bf16.msra.mxu0 %v2287_v22  ;;  %1756 = vmatpush3.bf16.msra.mxu1 %v2318_v31 }
 0x398   :  { %944 = vmatprep.subr.bf16.mxu0 %v2290_v23  ;;  %1757 = vmatprep.subr.bf16.mxu1 %v2780_v50 }
 0x39b   :  { %945 = vmatpush1.bf16.msra.mxu0 %v2292_v24  ;;  %1758 = vmatpush3.bf16.msra.mxu1 %v2328_v33 }
 0x39c   :  { %946 = vmatprep.subr.bf16.mxu0 %v2298_v27  ;;  %1759 = vmatprep.subr.bf16.mxu1 %v2780_v50 }
 0x39f   :  { %947 = vmatpush1.bf16.msra.mxu0 %v2307_v29  ;;  %1760 = vmatpush3.bf16.msra.mxu1 %v2334_v34 }
 0x3a0   :  { %948 = vmatprep.subr.bf16.mxu0 %v2315_v30  ;;  %1761 = vmatprep.subr.bf16.mxu1 %v2780_v50 }
 0x3a3   :  { %949 = vmatpush1.bf16.msra.mxu0 %v2323_v32  ;;  %1762 = vmatpush3.bf16.msra.mxu1 %v2342_v35 }
 0x3a4   :  { %1043 = vmatprep.subr.bf16.mxu0 %v2243_v5  ;;  %1767 = vmatprep.subr.bf16.mxu1 %v2780_v50 }
 0x459   :  { %v859_v59 = vpop.f32.mrb[28].mxu0  ;;  %v900_v40 = vpop.f32.mrb[20].mxu1 }
 0x45a   :  { %v860_v1 = vadd.f32 %v859_v59, %v2444_v51  ;;  %v861_v43 = vpop.f32.mrb[29].mxu0  ;;  %v1745_v44 = vpop.f32.mrb[21].mxu1  ;;  %v901_v6 = vadd.f32 %v900_v40, %v2452_v42 }
 0x45b   :  { %v862_v16 = vadd.f32 %v861_v43, %v2446_v55  ;;  %v863_v48 = vpop.f32.mrb[30].mxu0  ;;  %v903_v36 = vpop.f32.mrb[22].mxu1 }
 0x45c   :  { %v912_v53 = vadd.f32 %v860_v1, %v2400_v57  ;;  %v864_v62 = vpop.f32.mrb[31].mxu0  ;;  %v1746_v56 = vpop.f32.mrb[23].mxu1 }
 0x45d   :  { %v919_v3 = vadd.f32 %v862_v16, %v2405_v61 }
 0x45e   :  { %v1552_v15 = vmul.f32 -1.442695, %v912_v53 }
 0x45f   :  { %v1553_v45 = vmul.f32 -1.442695, %v919_v3 }
 0x460   :  { %1937 = vpow2.f32 %v1552_v15 }
 0x461   :  { %1939 = vpow2.f32 %v1553_v45 }
 0x46a   :  { %v1938_v58 = vpop.eup %1937 }
 0x46b   :  { %v916_v37 = vadd.f32 1.0, %v1938_v58  ;;  %v1940_v46 = vpop.eup %1939 }
 0x46c   :  { %v923_v12 = vadd.f32 1.0, %v1940_v46 }
 0x46d   :  { %1941 = vrcp.f32 %v916_v37 }
 0x46e   :  { %1943 = vrcp.f32 %v923_v12  ;;  %v2644_v12 = vld [vmem:[#allocation8] ss:$12 sps:$4 sm:$0xff]  }
 0x477   :  { %v1942_v49 = vpop.eup %1941 }
 0x478   :  { %v926_v52 = vmul.f32 %v1942_v49, %v901_v6  ;;  %v1944_v26 = vpop.eup %1943  ;;  %v2655_v6 = vld [vmem:[#allocation8 + $0x18] ss:$12 sps:$4 sm:$0xff]   ;;  %v2659_v49 = vld [vmem:[#allocation8 + $0x34] ss:$12 sps:$4 sm:$0xff]  }
 0x479   :  { %v929_v38 = vsub.f32 1.0, %v1944_v26  ;;  %v931_v41 = vmul.f32 %v1944_v26, %v2548_v39 }
 0x47a   :  { %v927_v57 = vadd.f32 %v926_v52, %v2408_v63  ;;  %v2667_v52 = vld [vmem:[#allocation8 + $0x4c] ss:$12 sps:$4 sm:$0xff]  }
 0x47c   :  { %1945 = vtanh.f32 %v927_v57  ;;  %v2671_v57 = vld [vmem:[#allocation8 + $0x48] ss:$12 sps:$4 sm:$0xff]  }
 0x486   :  { %v1946_v61 = vpop.eup %1945 }
 0x487   :  { %v930_v54 = vmul.f32 %v1946_v61, %v929_v38 }
 0x489   :  { %v2594_v2 = vadd.f32 %v931_v41, %v930_v54 }
 0x48b   :  { %v933_v0 = vpack.c.bf16 %v2594_v2, %v2594_v2 }
 0x48d   :  { %967 = vmatmul.mubr.bf16.vlgmr.msra.gmra.mrb[32].mxu0 %v933_v0  ;;  %1764 = vmatmul.mubr.bf16.vlgmr.msra.gmra.mrb[24].mxu1 %v933_v0 }
 0x48e   :  { %1044 = vmatpush1.bf16.msra.mxu0 %v2248_v7  ;;  %1768 = vmatpush3.bf16.msra.mxu1 %v2271_v17 }
 0x48f   :  { %1045 = vmatprep.subr.bf16.mxu0 %v2251_v8  ;;  %1769 = vmatprep.subr.bf16.mxu1 %v2780_v50 }
 0x490   :  { %1075 = vmatprep.mubr.bf16.mxu0 %v2781_v60  ;;  %1783 = vmatprep.mubr.msk.bf16.mxu1 %vm2139_vm2, %v2780_v50 }
 0x492   :  { %1046 = vmatpush1.bf16.msra.mxu0 %v2255_v9  ;;  %1770 = vmatpush3.bf16.msra.mxu1 %v2282_v21 }
 0x493   :  { %1047 = vmatprep.subr.bf16.mxu0 %v2259_v10  ;;  %1771 = vmatprep.subr.bf16.mxu1 %v2780_v50 }
 0x496   :  { %1048 = vmatpush1.bf16.msra.mxu0 %v2262_v13  ;;  %1772 = vmatpush3.bf16.msra.mxu1 %v2295_v25 }
 0x497   :  { %1049 = vmatprep.subr.bf16.mxu0 %v2265_v14  ;;  %1773 = vmatprep.subr.bf16.mxu1 %v2780_v50 }
 0x49a   :  { %1050 = vmatpush1.bf16.msra.mxu0 %v2274_v18  ;;  %1774 = vmatpush3.bf16.msra.mxu1 %v2303_v28 }
 0x49b   :  { %1051 = vmatprep.subr.bf16.mxu0 %v2278_v20  ;;  %1775 = vmatprep.subr.bf16.mxu1 %v2780_v50 }
 0x49e   :  { %1052 = vmatpush1.bf16.msra.mxu0 %v2287_v22  ;;  %1776 = vmatpush3.bf16.msra.mxu1 %v2318_v31 }
 0x49f   :  { %1053 = vmatprep.subr.bf16.mxu0 %v2290_v23  ;;  %1777 = vmatprep.subr.bf16.mxu1 %v2780_v50 }
 0x4a2   :  { %1054 = vmatpush1.bf16.msra.mxu0 %v2292_v24  ;;  %1778 = vmatpush3.bf16.msra.mxu1 %v2328_v33 }
 0x4a3   :  { %1055 = vmatprep.subr.bf16.mxu0 %v2298_v27  ;;  %1779 = vmatprep.subr.bf16.mxu1 %v2780_v50 }
 0x4a6   :  { %1056 = vmatpush1.bf16.msra.mxu0 %v2307_v29  ;;  %1780 = vmatpush3.bf16.msra.mxu1 %v2334_v34 }
 0x4a7   :  { %1057 = vmatprep.subr.bf16.mxu0 %v2315_v30  ;;  %1781 = vmatprep.subr.bf16.mxu1 %v2780_v50 }
 0x4aa   :  { %1058 = vmatpush1.bf16.msra.mxu0 %v2323_v32  ;;  %1782 = vmatpush3.bf16.msra.mxu1 %v2342_v35 }
 0x4ab   :  { %1152 = vmatprep.subr.bf16.mxu0 %v2243_v5  ;;  %1787 = vmatprep.subr.bf16.mxu1 %v2780_v50 }
 0x560   :  { %v968_v7 = vpop.f32.mrb[32].mxu0  ;;  %v1009_v8 = vpop.f32.mrb[24].mxu1 }
 0x561   :  { %v969_v9 = vadd.f32 %v968_v7, %v2444_v51  ;;  %v970_v10 = vpop.f32.mrb[33].mxu0  ;;  %v1765_v13 = vpop.f32.mrb[25].mxu1  ;;  %v1010_v53 = vadd.f32 %v1009_v8, %v2452_v42  ;;  %v2783_v8 = vld [vmem:[#allocation19_spill] sm:$0xff] }
 0x562   :  { %v971_v14 = vadd.f32 %v970_v10, %v2446_v55  ;;  %v972_v18 = vpop.f32.mrb[34].mxu0  ;;  %v1012_v63 = vpop.f32.mrb[26].mxu1 }
 0x563   :  { %v1021_v39 = vadd.f32 %v969_v9, %v2413_v4  ;;  %v973_v59 = vpop.f32.mrb[35].mxu0  ;;  %v1766_v40 = vpop.f32.mrb[27].mxu1 }
 0x564   :  { %v1028_v1 = vadd.f32 %v971_v14, %v2415_v11  ;;  %v1995_v59 = vld [vmem:[#allocation8 + $0x8] ss:$12 sps:$4 sm:$0xff]   ;;  %v1996_v40 = vld [vmem:[#allocation8 + $0x20] ss:$12 sps:$4 sm:$0xff]  }
 0x565   :  { %v1554_v43 = vmul.f32 -1.442695, %v1021_v39 }
 0x566   :  { %v1555_v5 = vmul.f32 -1.442695, %v1028_v1  ;;  %v1997_v1 = vld [vmem:[#allocation8 + $0x38] ss:$12 sps:$4 sm:$0xff]  }
 0x567   :  { %1947 = vpow2.f32 %v1554_v43  ;;  %v1999_v43 = vld [vmem:[#allocation8 + $0x64] ss:$12 sps:$4 sm:$0xff]  }
 0x568   :  { %1949 = vpow2.f32 %v1555_v5  ;;  %v2000_v5 = vld [vmem:[#allocation8 + $0x60] ss:$12 sps:$4 sm:$0xff]  }
 0x571   :  { %v1948_v44 = vpop.eup %1947 }
 0x572   :  { %v1025_v16 = vadd.f32 1.0, %v1948_v44  ;;  %v1950_v48 = vpop.eup %1949  ;;  %v2001_v44 = vld [vmem:[#allocation8 + $0x68] ss:$12 sps:$4 sm:$0xff]  }
 0x573   :  { %v1032_v36 = vadd.f32 1.0, %v1950_v48  ;;  %v2003_v48 = vld [vmem:[#allocation8 + $0x78] ss:$12 sps:$4 sm:$0xff]  }
 0x574   :  { %1951 = vrcp.f32 %v1025_v16  ;;  %v2002_v16 = vld [vmem:[#allocation8 + $0x7c] ss:$12 sps:$4 sm:$0xff]  }
 0x575   :  { %1953 = vrcp.f32 %v1032_v36  ;;  %v2004_v36 = vld [vmem:[#allocation8 + $0x80] ss:$12 sps:$4 sm:$0xff]  }
 0x57e   :  { %v1952_v62 = vpop.eup %1951 }
 0x57f   :  { %v1035_v56 = vmul.f32 %v1952_v62, %v1010_v53  ;;  %v1954_v3 = vpop.eup %1953  ;;  %v2005_v53 = vld [vmem:[#allocation8 + $0x94] ss:$12 sps:$4 sm:$0xff]   ;;  %v2006_v62 = vld [vmem:[#allocation8 + $0x90] ss:$12 sps:$4 sm:$0xff]  }
 0x580   :  { %v1038_v15 = vsub.f32 1.0, %v1954_v3  ;;  %v1040_v58 = vmul.f32 %v1954_v3, %v2594_v2  ;;  %v2009_v3 = vld [vmem:[#allocation8 + $0xa8] ss:$12 sps:$4 sm:$0xff]  }
 0x581   :  { %v1036_v4 = vadd.f32 %v1035_v56, %v2425_v47  ;;  %v2648_v47 = vld [vmem:[#allocation8 + $0x1c] ss:$12 sps:$4 sm:$0xff]   ;;  %v2007_v56 = vld [vmem:[#allocation8 + $0x98] ss:$12 sps:$4 sm:$0xff]  }
 0x583   :  { %1955 = vtanh.f32 %v1036_v4  ;;  %v2008_v4 = vld [vmem:[#allocation8 + $0xac] ss:$12 sps:$4 sm:$0xff]  }
 0x58d   :  { %v1956_v11 = vpop.eup %1955 }
 0x58e   :  { %v1039_v45 = vmul.f32 %v1956_v11, %v1038_v15  ;;  %v2010_v15 = vld [vmem:[#allocation8 + $0xb0] ss:$12 sps:$4 sm:$0xff]  }
 0x590   :  { %v2640_v37 = vadd.f32 %v1040_v58, %v1039_v45 }
 0x592   :  { %v1042_v46 = vpack.c.bf16 %v2640_v37, %v2640_v37 }
 0x594   :  { %1076 = vmatmul.mubr.bf16.vlgmr.msra.gmra.mrb[36].mxu0 %v1042_v46  ;;  %1784 = vmatmul.mubr.bf16.vlgmr.msra.gmra.mrb[28].mxu1 %v1042_v46 }
 0x595   :  { %1153 = vmatpush1.bf16.msra.mxu0 %v2644_v12  ;;  %1788 = vmatpush3.bf16.msra.mxu1 %v2271_v17  ;;  %v2663_v17 = vld [vmem:[#allocation8 + $0x30] ss:$12 sps:$4 sm:$0xff]  }
 0x596   :  { %1154 = vmatprep.subr.bf16.mxu0 %v2648_v47  ;;  %1789 = vmatprep.subr.bf16.mxu1 %v2780_v50 }
 0x597   :  { %1184 = vmatprep.mubr.bf16.mxu0 %v2781_v60  ;;  %1803 = vmatprep.mubr.msk.bf16.mxu1 %vm2139_vm2, %v2780_v50 }
 0x599   :  { %1155 = vmatpush1.bf16.msra.mxu0 %v2655_v6  ;;  %1790 = vmatpush3.bf16.msra.mxu1 %v2282_v21 }
 0x59a   :  { %1156 = vmatprep.subr.bf16.mxu0 %v2659_v49  ;;  %1791 = vmatprep.subr.bf16.mxu1 %v2780_v50 }
 0x59d   :  { %1157 = vmatpush1.bf16.msra.mxu0 %v2663_v17  ;;  %1792 = vmatpush3.bf16.msra.mxu1 %v2295_v25 }
 0x59e   :  { %1158 = vmatprep.subr.bf16.mxu0 %v2667_v52  ;;  %1793 = vmatprep.subr.bf16.mxu1 %v2780_v50 }
 0x5a1   :  { %1159 = vmatpush1.bf16.msra.mxu0 %v2671_v57  ;;  %1794 = vmatpush3.bf16.msra.mxu1 %v2303_v28 }
 0x5a2   :  { %1160 = vmatprep.subr.bf16.mxu0 %v2278_v20  ;;  %1795 = vmatprep.subr.bf16.mxu1 %v2780_v50  ;;  %v1994_v20 = vld [vmem:[#allocation8 + $0x4] ss:$12 sps:$4 sm:$0xff]  }
 0x5a5   :  { %1161 = vmatpush1.bf16.msra.mxu0 %v2287_v22  ;;  %1796 = vmatpush3.bf16.msra.mxu1 %v2318_v31 }
 0x5a6   :  { %1162 = vmatprep.subr.bf16.mxu0 %v2290_v23  ;;  %1797 = vmatprep.subr.bf16.mxu1 %v2780_v50 }
 0x5a9   :  { %1163 = vmatpush1.bf16.msra.mxu0 %v2292_v24  ;;  %1798 = vmatpush3.bf16.msra.mxu1 %v2328_v33  ;;  %v2782_v33 = vld [vmem:[#allocation17_spill] sm:$0xff] }
 0x5aa   :  { %1164 = vmatprep.subr.bf16.mxu0 %v2298_v27  ;;  %1799 = vmatprep.subr.bf16.mxu1 %v2780_v50 }
 0x5ad   :  { %1165 = vmatpush1.bf16.msra.mxu0 %v2307_v29  ;;  %1800 = vmatpush3.bf16.msra.mxu1 %v2334_v34 }
 0x5ae   :  { %1166 = vmatprep.subr.bf16.mxu0 %v2315_v30  ;;  %1801 = vmatprep.subr.bf16.mxu1 %v2780_v50 }
 0x5b1   :  { %1167 = vmatpush1.bf16.msra.mxu0 %v2323_v32  ;;  %1802 = vmatpush3.bf16.msra.mxu1 %v2342_v35 }
 0x5b2   :  { %1261 = vmatprep.subr.bf16.mxu0 %v1994_v20  ;;  %1807 = vmatprep.subr.bf16.mxu1 %v2780_v50  ;;  %v2785_v20 = vld [vmem:[#allocation21_spill] sm:$0xff] }
 0x667   :  { %v1077_v21 = vpop.f32.mrb[36].mxu0  ;;  %v1118_v22 = vpop.f32.mrb[28].mxu1 }
 0x668   :  { %v1078_v23 = vadd.f32 %v1077_v21, %v2444_v51  ;;  %v1079_v24 = vpop.f32.mrb[37].mxu0  ;;  %v1785_v25 = vpop.f32.mrb[29].mxu1  ;;  %v1119_v2 = vadd.f32 %v1118_v22, %v2452_v42 }
 0x669   :  { %v1080_v27 = vadd.f32 %v1079_v24, %v2446_v55  ;;  %v1081_v28 = vpop.f32.mrb[38].mxu0  ;;  %v1121_v29 = vpop.f32.mrb[30].mxu1 }
 0x66a   :  { %v1130_v30 = vadd.f32 %v1078_v23, %v2417_v19  ;;  %v1082_v31 = vpop.f32.mrb[39].mxu0  ;;  %v1786_v32 = vpop.f32.mrb[31].mxu1 }
 0x66b   :  { %v1137_v34 = vadd.f32 %v1080_v27, %v2782_v33  ;;  %v2786_v32 = vld [vmem:[#allocation16_spill] sm:$0xff] }
 0x66c   :  { %v1556_v35 = vmul.f32 -1.442695, %v1130_v30 }
 0x66d   :  { %v1557_v26 = vmul.f32 -1.442695, %v1137_v34 }
 0x66e   :  { %1957 = vpow2.f32 %v1556_v35 }
 0x66f   :  { %1959 = vpow2.f32 %v1557_v26 }
 0x678   :  { %v1958_v38 = vpop.eup %1957 }
 0x679   :  { %v1134_v61 = vadd.f32 1.0, %v1958_v38  ;;  %v1960_v54 = vpop.eup %1959 }
 0x67a   :  { %v1141_v41 = vadd.f32 1.0, %v1960_v54 }
 0x67b   :  { %1961 = vrcp.f32 %v1134_v61 }
 0x67c   :  { %1963 = vrcp.f32 %v1141_v41 }
 0x685   :  { %v1962_v0 = vpop.eup %1961 }
 0x686   :  { %v1144_v7 = vmul.f32 %v1962_v0, %v1119_v2  ;;  %v1964_v9 = vpop.eup %1963  ;;  %v1899_v2 = vld [vmem:[#allocation9] sm:$0xff]   ;;  %v1900_v0 = vld [vmem:[#allocation9 + $0x8] sm:$0xff]  }
 0x687   :  { %v1147_v10 = vsub.f32 1.0, %v1964_v9  ;;  %v1149_v18 = vmul.f32 %v1964_v9, %v2640_v37  ;;  %v1904_v9 = vld [vmem:[#allocation9 + $0x28] sm:$0xff]  }
 0x688   :  { %v1145_v19 = vadd.f32 %v1144_v7, %v2783_v8  ;;  %v1901_v7 = vld [vmem:[#allocation9 + $0x10] sm:$0xff]   ;;  %v1902_v8 = vld [vmem:[#allocation9 + $0x18] sm:$0xff]  }
 0x68a   :  { %1965 = vtanh.f32 %v1145_v19  ;;  %v1903_v19 = vld [vmem:[#allocation9 + $0x20] sm:$0xff]  }
 0x694   :  { %v1966_v13 = vpop.eup %1965 }
 0x695   :  { %v1148_v14 = vmul.f32 %v1966_v13, %v1147_v10  ;;  %v1905_v10 = vld [vmem:[#allocation9 + $0x30] sm:$0xff]   ;;  %v1906_v13 = vld [vmem:[#allocation9 + $0x38] sm:$0xff]  }
 0x697   :  { %v2699_v63 = vadd.f32 %v1149_v18, %v1148_v14 }
 0x699   :  { %v1151_v39 = vpack.c.bf16 %v2699_v63, %v2699_v63 }
 0x69b   :  { %1185 = vmatmul.mubr.bf16.vlgmr.msra.gmra.mrb[40].mxu0 %v1151_v39  ;;  %1804 = vmatmul.mubr.bf16.vlgmr.msra.gmra.mrb[32].mxu1 %v1151_v39 }
 0x69c   :  { %1262 = vmatpush1.bf16.msra.mxu0 %v2644_v12  ;;  %1808 = vmatpush3.bf16.msra.mxu1 %v1995_v59 }
 0x69d   :  { %1263 = vmatprep.subr.bf16.mxu0 %v2648_v47  ;;  %1809 = vmatprep.subr.bf16.mxu1 %v2780_v50 }
 0x69e   :  { %1293 = vmatprep.mubr.bf16.mxu0 %v2781_v60  ;;  %1823 = vmatprep.mubr.msk.bf16.mxu1 %vm2139_vm2, %v2780_v50  ;;  %v1998_v60 = vld [vmem:[#allocation8 + $0x50] ss:$12 sps:$4 sm:$0xff]  }
 0x6a0   :  { %1264 = vmatpush1.bf16.msra.mxu0 %v2655_v6  ;;  %1810 = vmatpush3.bf16.msra.mxu1 %v1996_v40 }
 0x6a1   :  { %1265 = vmatprep.subr.bf16.mxu0 %v2659_v49  ;;  %1811 = vmatprep.subr.bf16.mxu1 %v2780_v50  ;;  %v2784_v49 = vld [vmem:[#allocation20_spill] sm:$0xff] }
 0x6a4   :  { %1266 = vmatpush1.bf16.msra.mxu0 %v2663_v17  ;;  %1812 = vmatpush3.bf16.msra.mxu1 %v1997_v1 }
 0x6a5   :  { %1267 = vmatprep.subr.bf16.mxu0 %v2667_v52  ;;  %1813 = vmatprep.subr.bf16.mxu1 %v2780_v50 }
 0x6a8   :  { %1268 = vmatpush1.bf16.msra.mxu0 %v2671_v57  ;;  %1814 = vmatpush3.bf16.msra.mxu1 %v1998_v60 }
 0x6a9   :  { %1269 = vmatprep.subr.bf16.mxu0 %v1999_v43  ;;  %1815 = vmatprep.subr.bf16.mxu1 %v2780_v50  ;;  %v2787_v43 = vld [vmem:[#allocation22_spill] sm:$0xff] }
 0x6ac   :  { %1270 = vmatpush1.bf16.msra.mxu0 %v2000_v5  ;;  %1816 = vmatpush3.bf16.msra.mxu1 %v2001_v44 }
 0x6ad   :  { %1271 = vmatprep.subr.bf16.mxu0 %v2002_v16  ;;  %1817 = vmatprep.subr.bf16.mxu1 %v2780_v50 }
 0x6b0   :  { %1272 = vmatpush1.bf16.msra.mxu0 %v2003_v48  ;;  %1818 = vmatpush3.bf16.msra.mxu1 %v2004_v36  ;;  %v2788_v48 = vld [vmem:[#allocation23_spill] sm:$0xff] }
 0x6b1   :  { %1273 = vmatprep.subr.bf16.mxu0 %v2005_v53  ;;  %1819 = vmatprep.subr.bf16.mxu1 %v2780_v50 }
 0x6b4   :  { %1274 = vmatpush1.bf16.msra.mxu0 %v2006_v62  ;;  %1820 = vmatpush3.bf16.msra.mxu1 %v2007_v56 }
 0x6b5   :  { %1275 = vmatprep.subr.bf16.mxu0 %v2008_v4  ;;  %1821 = vmatprep.subr.bf16.mxu1 %v2780_v50 }
 0x6b8   :  { %1276 = vmatpush1.bf16.msra.mxu0 %v2009_v3  ;;  %1822 = vmatpush3.bf16.msra.mxu1 %v2010_v15 }
 0x6b9   :  { %1827 = vmatprep.subr.bf16.mxu0 %v2780_v50 }
 0x76e   :  { %v1186_v11 = vpop.f32.mrb[40].mxu0  ;;  %v1227_v45 = vpop.f32.mrb[32].mxu1 }
 0x76f   :  { %v1187_v58 = vadd.f32 %v1186_v11, %v2444_v51  ;;  %v1188_v37 = vpop.f32.mrb[41].mxu0  ;;  %v1805_v46 = vpop.f32.mrb[33].mxu1  ;;  %v1228_v29 = vadd.f32 %v1227_v45, %v2452_v42  ;;  %v2789_v11 = vld [vmem:[#allocation18_spill] sm:$0xff] }
 0x770   :  { %v1189_v12 = vadd.f32 %v1188_v37, %v2446_v55  ;;  %v1190_v47 = vpop.f32.mrb[42].mxu0  ;;  %v1230_v6 = vpop.f32.mrb[34].mxu1 }
 0x771   :  { %v1239_v17 = vadd.f32 %v1187_v58, %v2784_v49  ;;  %v1191_v52 = vpop.f32.mrb[43].mxu0  ;;  %v1806_v57 = vpop.f32.mrb[35].mxu1 }
 0x772   :  { %v1246_v21 = vadd.f32 %v1189_v12, %v2785_v20 }
 0x773   :  { %v1558_v22 = vmul.f32 -1.442695, %v1239_v17  ;;  %v1562_v17 = vld [vmem:[%s2764_s6] ss:$0 sm:$0xff] }
 0x774   :  { %v1559_v23 = vmul.f32 -1.442695, %v1246_v21 }
 0x775   :  { %1967 = vpow2.f32 %v1558_v22 }
 0x776   :  { %1969 = vpow2.f32 %v1559_v23 }
 0x77f   :  { %v1968_v24 = vpop.eup %1967 }
 0x780   :  { %v1243_v25 = vadd.f32 1.0, %v1968_v24  ;;  %v1970_v27 = vpop.eup %1969 }
 0x781   :  { %v1250_v28 = vadd.f32 1.0, %v1970_v27 }
 0x782   :  { %1971 = vrcp.f32 %v1243_v25 }
 0x783   :  { %1973 = vrcp.f32 %v1250_v28 }
 0x78c   :  { %v1972_v30 = vpop.eup %1971 }
 0x78d   :  { %v1253_v31 = vmul.f32 %v1972_v30, %v1228_v29  ;;  %v1974_v34 = vpop.eup %1973 }
 0x78e   :  { %v1256_v35 = vsub.f32 1.0, %v1974_v34  ;;  %v1258_v61 = vmul.f32 %v1974_v34, %v2699_v63 }
 0x78f   :  { %v1254_v33 = vadd.f32 %v1253_v31, %v2786_v32 }
 0x791   :  { %1975 = vtanh.f32 %v1254_v33 }
 0x79b   :  { %v1976_v26 = vpop.eup %1975 }
 0x79c   :  { %v1257_v38 = vmul.f32 %v1976_v26, %v1256_v35 }
 0x79e   :  { %v1259_v54 = vadd.f32 %v1258_v61, %v1257_v38 }
 0x7a0   :  { %v1260_v41 = vpack.c.bf16 %v1259_v54, %v1259_v54 }
 0x7a2   :  { %1294 = vmatmul.mubr.bf16.vlgmr.msra.gmra.mrb[44].mxu0 %v1260_v41  ;;  %1824 = vmatmul.mubr.bf16.vlgmr.msra.gmra.mrb[36].mxu1 %v1260_v41 }
 0x7a3   :  { %1843 = vmatprep.mubr.msk.bf16.mxu0 %vm2139_vm2, %v2780_v50  ;;  %1828 = vmatpush3.bf16.msra.mxu0 %v1899_v2 }
 0x7a4   :  { %1829 = vmatprep.subr.bf16.mxu0 %v2780_v50 }
 0x7a7   :  { %1830 = vmatpush3.bf16.msra.mxu0 %v1900_v0 }
 0x7a8   :  { %1831 = vmatprep.subr.bf16.mxu0 %v2780_v50 }
 0x7ab   :  { %1832 = vmatpush3.bf16.msra.mxu0 %v1901_v7 }
 0x7ac   :  { %1833 = vmatprep.subr.bf16.mxu0 %v2780_v50 }
 0x7af   :  { %1834 = vmatpush3.bf16.msra.mxu0 %v1902_v8 }
 0x7b0   :  { %1835 = vmatprep.subr.bf16.mxu0 %v2780_v50 }
 0x7b3   :  { %1836 = vmatpush3.bf16.msra.mxu0 %v1903_v19 }
 0x7b4   :  { %1837 = vmatprep.subr.bf16.mxu0 %v2780_v50 }
 0x7b7   :  { %1838 = vmatpush3.bf16.msra.mxu0 %v1904_v9 }
 0x7b8   :  { %1839 = vmatprep.subr.bf16.mxu0 %v2780_v50 }
 0x7bb   :  { %1840 = vmatpush3.bf16.msra.mxu0 %v1905_v10 }
 0x7bc   :  { %1841 = vmatprep.subr.bf16.mxu0 %v2780_v50 }
 0x7bf   :  { %1842 = vmatpush3.bf16.msra.mxu0 %v1906_v13 }
 0x875   :  { %v1295_v14 = vpop.f32.mrb[44].mxu0  ;;  %v1336_v18 = vpop.f32.mrb[36].mxu1 }
 0x876   :  { %v1296_v63 = vadd.f32 %v1295_v14, %v2444_v51  ;;  %v1297_v39 = vpop.f32.mrb[45].mxu0  ;;  %v1825_v59 = vpop.f32.mrb[37].mxu1  ;;  %v1337_v3 = vadd.f32 %v1336_v18, %v2452_v42 }
 0x877   :  { %v1298_v40 = vadd.f32 %v1297_v39, %v2446_v55  ;;  %v1299_v1 = vpop.f32.mrb[46].mxu0  ;;  %v1339_v60 = vpop.f32.mrb[38].mxu1 }
 0x878   :  { %v1348_v5 = vadd.f32 %v1296_v63, %v2787_v43  ;;  %v1300_v44 = vpop.f32.mrb[47].mxu0  ;;  %v1826_v16 = vpop.f32.mrb[39].mxu1 }
 0x879   :  { %v1355_v36 = vadd.f32 %v1298_v40, %v2788_v48 }
 0x87a   :  { %v1560_v53 = vmul.f32 -1.442695, %v1348_v5 }
 0x87b   :  { %v1561_v50 = vmul.f32 -1.442695, %v1355_v36 }
 0x87c   :  { %1977 = vpow2.f32 %v1560_v53 }
 0x87d   :  { %1979 = vpow2.f32 %v1561_v50 }
 0x886   :  { %v1978_v62 = vpop.eup %1977 }
 0x887   :  { %v1352_v56 = vadd.f32 1.0, %v1978_v62  ;;  %v1980_v51 = vpop.eup %1979 }
 0x888   :  { %v1359_v4 = vadd.f32 1.0, %v1980_v51 }
 0x889   :  { %1981 = vrcp.f32 %v1352_v56 }
 0x88a   :  { %1983 = vrcp.f32 %v1359_v4 }
 0x893   :  { %v1982_v55 = vpop.eup %1981 }
 0x894   :  { %v1362_v15 = vmul.f32 %v1982_v55, %v1337_v3  ;;  %v1984_v58 = vpop.eup %1983 }
 0x895   :  { %v1365_v37 = vsub.f32 1.0, %v1984_v58  ;;  %v1367_v47 = vmul.f32 %v1984_v58, %v1259_v54 }
 0x896   :  { %v1363_v45 = vadd.f32 %v1362_v15, %v2789_v11 }
 0x898   :  { %1985 = vtanh.f32 %v1363_v45 }
 0x8a2   :  { %v1986_v46 = vpop.eup %1985 }
 0x8a3   :  { %v1366_v12 = vmul.f32 %v1986_v46, %v1365_v37 }
 0x8a5   :  { %v1368_v6 = vadd.f32 %v1367_v47, %v1366_v12 }
 0x8a7   :  { %v1369_v49 = vpack.c.bf16 %v1368_v6, %v1368_v6 }
 0x8a9   :  { %1844 = vmatmul.mubr.bf16.vlgmr.msra.gmra.mrb[48].mxu0 %v1369_v49 }
 0x97c   :  { %v1475_v42 = vpop.f32.mrb[48].mxu0 }
 0x97d   :  { %v1476_v52 = vadd.f32 %v1562_v17, %v1475_v42  ;;  %v1845_v57 = vpop.f32.mrb[49].mxu0 }
 0x97e   :  { %v1478_v20 = vpop.f32.mrb[50].mxu0 }
 0x97f   :  { %1481 = vst [vmem:[#allocation11] sm:$0xff] %v1476_v52  ;;  %v1846_v21 = vpop.f32.mrb[51].mxu0 }
 0x980   :  { %2110 = shalt.err (!%p2107_p8)
}
 0x981   :  { %s2111_s6 = scalar_lea.hbm %s2765_s7, 128 }
 0x982   :  { %p2112_p9 = scmp.ne.s32.totalorder %s2765_s7, %s2111_s6  ;;  %p2115_p10 = scmp.lt.u32.totalorder %s2111_s6, %s2765_s7 }
 0x984   :  { %p2117_p11 = pnand %p2115_p10, %p2112_p9 }
 0x986   :  { %2120 = shalt.err (!%p2117_p11)
}
 0x987   :  { %1491 = dma.vmem_to_hbm [thread:$0]  %s1489_s8, 128, %s2765_s7, [#allocation5]  }
 0x988   :  { %2127 = dma.done.wait [#allocation5], 128  }
 0x989   :  { %2128 = vsyncadd [#allocation5], 4294967168 }
 0x98a   :  { %1495 = vsyncpa [#allocation4], 1 }
 0x98b   :  { %1496 = vsyncpa [#allocation7], 1 }
 0x98c   :  { %1497 = vsyncpa [#allocation10], 1 }
 0x98d   :  { %1498 = vsyncpa [#allocation5], 1 }

</bundles_post_ra>
